<compile_context>
chip_gen: v6e
topology: v6e:2x2x1
jax: 0.10.0
libtpu: 0.0.40
codegen_flags: <defaults>
</compile_context>

<pallas_src>
import jax
import jax.numpy as jnp
from jax import lax
from jax.experimental import pallas as pl
from jax.experimental.pallas import tpu as pltpu


# --------------------------------------------------------------------------------------
# helpers
# --------------------------------------------------------------------------------------
def _full_spec(shape):
    """BlockSpec covering the entire array (grid=(1,))."""
    n = len(shape)
    return pl.BlockSpec(shape, lambda i, _n=n: (0,) * _n)


def _lstm_cell(gates, c_prev, H):
    """PyTorch gate order i, f, g, o.  gates: (B, 4H) f32; c_prev: (B, H) f32."""
    i = jax.nn.sigmoid(gates[:, 0 * H:1 * H])
    f = jax.nn.sigmoid(gates[:, 1 * H:2 * H])
    g = jnp.tanh(gates[:, 2 * H:3 * H])
    o = jax.nn.sigmoid(gates[:, 3 * H:4 * H])
    c_new = f * c_prev + i * g
    h_new = o * jnp.tanh(c_new)
    return h_new, c_new


# --------------------------------------------------------------------------------------
# Pallas kernel 1: fused bidirectional full-sequence LSTM (one layer, both directions)
# --------------------------------------------------------------------------------------
def _bilstm_seq_kernel(gxf_ref, gxb_ref, h0f_ref, c0f_ref, h0b_ref, c0b_ref,
                       whhf_ref, whhb_ref,
                       out_ref, hTf_ref, cTf_ref, hTb_ref, cTb_ref):
    T = gxf_ref.shape[0]
    H = h0f_ref.shape[-1]
    whh_f = whhf_ref[...]            # (H, 4H) bf16, resident in VMEM for the whole call
    whh_b = whhb_ref[...]

    def step(s, carry):
        hf, cf, hb, cb = carry
        tb = T - 1 - s               # backward direction walks time in reverse
        gf = gxf_ref[s] + jnp.dot(hf.astype(whh_f.dtype), whh_f,
                                  preferred_element_type=jnp.float32)
        gb = gxb_ref[tb] + jnp.dot(hb.astype(whh_b.dtype), whh_b,
                                   preferred_element_type=jnp.float32)
        hf_new, cf_new = _lstm_cell(gf, cf, H)
        hb_new, cb_new = _lstm_cell(gb, cb, H)
        out_ref[s, :, 0:H] = hf_new.astype(out_ref.dtype)
        out_ref[tb, :, H:2 * H] = hb_new.astype(out_ref.dtype)
        return hf_new, cf_new, hb_new, cb_new

    hf, cf, hb, cb = lax.fori_loop(
        0, T, step,
        (h0f_ref[...], c0f_ref[...], h0b_ref[...], c0b_ref[...]),
        unroll=True)
    hTf_ref[...] = hf
    cTf_ref[...] = cf
    hTb_ref[...] = hb
    cTb_ref[...] = cb


def bilstm_layer(x, h0f, c0f, h0b, c0b, p_f, p_b):
    """x: (T,B,Din) time-major f32.  Returns (out (T,B,2H), hTf, cTf, hTb, cTb)."""
    T, B, Din = x.shape
    H = h0f.shape[-1]
    x_bf = x.astype(jnp.bfloat16)
    # Hoisted input projection (one big MXU-friendly matmul per direction, f32 accum).
    gx_f = jnp.einsum("tbd,dh->tbh", x_bf, p_f["wih"].astype(jnp.bfloat16),
                      preferred_element_type=jnp.float32) + (p_f["b_ih"] + p_f["b_hh"])
    gx_b = jnp.einsum("tbd,dh->tbh", x_bf, p_b["wih"].astype(jnp.bfloat16),
                      preferred_element_type=jnp.float32) + (p_b["b_ih"] + p_b["b_hh"])
    whh_f = p_f["whh"].astype(jnp.bfloat16)
    whh_b = p_b["whh"].astype(jnp.bfloat16)

    out, hTf, cTf, hTb, cTb = pl.pallas_call(
        _bilstm_seq_kernel,
        out_shape=(jax.ShapeDtypeStruct((T, B, 2 * H), jnp.float32),
                   jax.ShapeDtypeStruct((B, H), jnp.float32),
                   jax.ShapeDtypeStruct((B, H), jnp.float32),
                   jax.ShapeDtypeStruct((B, H), jnp.float32),
                   jax.ShapeDtypeStruct((B, H), jnp.float32)),
        grid_spec=pltpu.PrefetchScalarGridSpec(
            num_scalar_prefetch=0,
            grid=(1,),
            in_specs=[_full_spec((T, B, 4 * H)),
                      _full_spec((T, B, 4 * H)),
                      _full_spec((B, H)), _full_spec((B, H)),
                      _full_spec((B, H)), _full_spec((B, H)),
                      _full_spec((H, 4 * H)), _full_spec((H, 4 * H))],
            out_specs=[_full_spec((T, B, 2 * H)),
                       _full_spec((B, H)), _full_spec((B, H)),
                       _full_spec((B, H)), _full_spec((B, H))]),
        compiler_params=pltpu.CompilerParams(dimension_semantics=("arbitrary",)),
    )(gx_f, gx_b, h0f, c0f, h0b, c0b, whh_f, whh_b)
    return out, hTf, cTf, hTb, cTb


def bi_lstm(x, hidden, layer_params, num_layers):
    """Bidirectional multi-layer LSTM (shared `token_lstm`).
    hidden: (h0, c0) each (2*num_layers, B, H), PyTorch layout layer*2 + dir."""
    h0_all, c0_all = hidden
    inp = x
    h_fin, c_fin = [], []
    for l in range(num_layers):
        p_f = layer_params[l]["fwd"]
        p_b = layer_params[l]["bwd"]
        out, hTf, cTf, hTb, cTb = bilstm_layer(
            inp, h0_all[2 * l], c0_all[2 * l], h0_all[2 * l + 1], c0_all[2 * l + 1],
            p_f, p_b)
        inp = out                               # (T, B, 2H)
        h_fin += [hTf, hTb]
        c_fin += [cTf, cTb]
    # TODO(synk): inter-layer dropout (args.dropout_p) not modelled (inactive for L=1 / eval).
    return inp, (jnp.stack(h_fin, axis=0), jnp.stack(c_fin, axis=0))


# --------------------------------------------------------------------------------------
# Pallas kernel 2: unidirectional full-sequence LSTM (pointer-net decoder)
# --------------------------------------------------------------------------------------
def _lstm_seq_kernel(gx_ref, h0_ref, c0_ref, whh_ref, out_ref, hT_ref, cT_ref):
    T = gx_ref.shape[0]
    H = h0_ref.shape[-1]
    whh = whh_ref[...]               # (H, 4H) bf16

    def step(t, carry):
        h, c = carry
        g = gx_ref[t] + jnp.dot(h.astype(whh.dtype), whh,
                                preferred_element_type=jnp.float32)
        h_new, c_new = _lstm_cell(g, c, H)
        out_ref[t] = h_new.astype(out_ref.dtype)
        return h_new, c_new

    h, c = lax.fori_loop(0, T, step, (h0_ref[...], c0_ref[...]), unroll=True)
    hT_ref[...] = h
    cT_ref[...] = c


def lstm_seq(x, h0, c0, p):
    """x: (T,B,Din) time-major; returns (out (T,B,H), h_T, c_T)."""
    T, B, Din = x.shape
    H = h0.shape[-1]
    gx = jnp.einsum("tbd,dh->tbh", x.astype(jnp.bfloat16),
                    p["wih"].astype(jnp.bfloat16),
                    preferred_element_type=jnp.float32) + (p["b_ih"] + p["b_hh"])
    whh = p["whh"].astype(jnp.bfloat16)
    out, hT, cT = pl.pallas_call(
        _lstm_seq_kernel,
        out_shape=(jax.ShapeDtypeStruct((T, B, H), jnp.float32),
                   jax.ShapeDtypeStruct((B, H), jnp.float32),
                   jax.ShapeDtypeStruct((B, H), jnp.float32)),
        grid_spec=pltpu.PrefetchScalarGridSpec(
            num_scalar_prefetch=0,
            grid=(1,),
            in_specs=[_full_spec((T, B, 4 * H)),
                      _full_spec((B, H)), _full_spec((B, H)),
                      _full_spec((H, 4 * H))],
            out_specs=[_full_spec((T, B, H)),
                       _full_spec((B, H)), _full_spec((B, H))]),
        compiler_params=pltpu.CompilerParams(dimension_semantics=("arbitrary",)),
    )(gx, h0, c0, whh)
    return out, hT, cT


# --------------------------------------------------------------------------------------
# Pallas kernel 3: pointer attention, fused over the whole batch
# --------------------------------------------------------------------------------------
def _ptr_attn_kernel(q_ref, m_ref, o_ref):
    q = q_ref[...].astype(jnp.bfloat16)          # (B, Tq, D2)
    m = m_ref[...].astype(jnp.bfloat16)          # (B, Ts, D2)
    s = jnp.einsum("bqd,bsd->bqs", q, m, preferred_element_type=jnp.float32)
    s = s - jnp.max(s, axis=-1, keepdims=True)
    e = jnp.exp(s)
    denom = jnp.sum(e, axis=-1, keepdims=True)
    o_ref[...] = (e * pl.reciprocal(denom, approx=True)).astype(o_ref.dtype)


def pointer_attention(dec_out, memory):
    """dec_out: (B, Tq, D2), memory: (B, Ts, D2) -> softmax scores (B, Tq, Ts)."""
    B, Tq, D2 = dec_out.shape
    Ts = memory.shape[1]
    return pl.pallas_call(
        _ptr_attn_kernel,
        out_shape=jax.ShapeDtypeStruct((B, Tq, Ts), jnp.float32),
        grid_spec=pltpu.PrefetchScalarGridSpec(
            num_scalar_prefetch=0,
            grid=(1,),
            in_specs=[_full_spec((B, Tq, D2)), _full_spec((B, Ts, D2))],
            out_specs=_full_spec((B, Tq, Ts))),
        compiler_params=pltpu.CompilerParams(dimension_semantics=("arbitrary",)),
    )(dec_out, memory)


# --------------------------------------------------------------------------------------
# Glue: table-encoder marker gather, parameter init, full forward
# --------------------------------------------------------------------------------------
def gather_markers(out_tbd, marker):
    """out_tbd: (T, B, D2), marker: (B, M) time indices -> (M, B, D2)."""
    out_btd = jnp.transpose(out_tbd, (1, 0, 2))
    gathered = jnp.take_along_axis(out_btd, marker[:, :, None], axis=1)
    return jnp.transpose(gathered, (1, 0, 2))


def init_params(key, vocab_size, n_pos, word_dim, hidden_size, num_layers):
    keys = iter(jax.random.split(key, 128))

    def lin(shape, scale=0.1):
        return (scale * jax.random.normal(next(keys), shape)).astype(jnp.float32)

    params = {
        "token_embedding": lin((vocab_size, word_dim)),
        "pos_tag_embedding": lin((n_pos, word_dim)),
        "token_lstm": [],
    }
    H = hidden_size
    for l in range(num_layers):
        din = word_dim if l == 0 else 2 * H
        layer = {}
        for d in ("fwd", "bwd"):
            layer[d] = {"wih": lin((din, 4 * H)),
                        "whh": lin((H, 4 * H)),
                        "b_ih": lin((4 * H,)),
                        "b_hh": lin((4 * H,))}
        params["token_lstm"].append(layer)
    # pointer-net decoder: unidirectional LSTM, hidden = 2H (matches bi-encoder width)
    params["decoder_lstm"] = {"wih": lin((word_dim, 4 * 2 * H)),
                              "whh": lin((2 * H, 4 * 2 * H)),
                              "b_ih": lin((4 * 2 * H,)),
                              "b_hh": lin((4 * 2 * H,))}
    return params


def baseline_forward(params, inputs, hidden_size, num_layers):
    (tokenize, tokenize_len) = inputs[0]
    pos_tag = inputs[1][0]
    (columns_split, columns_split_len) = inputs[2]
    (columns_split_marker, _) = inputs[3]
    (cells_split, cells_split_len) = inputs[4]
    (cells_split_marker, _) = inputs[5]

    B = tokenize.shape[0]
    H, L = hidden_size, num_layers
    emb = params["token_embedding"]
    pos_emb = params["pos_tag_embedding"]

    # time-major embeddings (T, B, D) — gather directly in the target layout
    token_embed = jnp.take(emb, tokenize.T, axis=0)
    pos_tag_embed = jnp.take(pos_emb, pos_tag.T, axis=0)
    token_embed = token_embed + pos_tag_embed

    zero_hidden = (jnp.zeros((2 * L, B, H), jnp.float32),
                   jnp.zeros((2 * L, B, H), jnp.float32))
    # TODO(synk): runBiRNN uses pack_padded_sequence over tokenize_len; here lengths
    #             equal total_length so packed == unpacked (variable-length masking not modelled).
    token_out, token_hidden = bi_lstm(token_embed, zero_hidden, params["token_lstm"], L)

    col_embed = jnp.take(emb, columns_split.T, axis=0)
    col_birnn_out, col_hidden = bi_lstm(col_embed, token_hidden, params["token_lstm"], L)
    # TODO(synk): TableRNNEncoder source not provided; approximated as BiRNN + gather at split markers.
    col_out = gather_markers(col_birnn_out, columns_split_marker)                   # (Mc,B,2H)

    cell_embed = jnp.take(emb, cells_split.T, axis=0)
    cell_birnn_out, cell_hidden = bi_lstm(cell_embed, col_hidden, params["token_lstm"], L)
    cell_out = gather_markers(cell_birnn_out, cells_split_marker)                   # (Me,B,2H)

    memory_bank = jnp.concatenate([token_out, col_out, cell_out], axis=0)           # (Ts,B,2H)
    memory_bank = jnp.transpose(memory_bank, (1, 0, 2))                             # (B,Ts,2H)

    # TODO(synk): PointerNetRNNDecoder source not provided; implemented as a uni-LSTM decoder
    #             (hidden 2H, init from last-layer bi hidden of col_hidden) + dot-attention softmax.
    h0 = jnp.concatenate([col_hidden[0][-2], col_hidden[0][-1]], axis=-1)           # (B,2H)
    c0 = jnp.concatenate([col_hidden[1][-2], col_hidden[1][-1]], axis=-1)
    dec_out, _, _ = lstm_seq(token_embed, h0, c0, params["decoder_lstm"])           # (Tq,B,2H)
    dec_out = jnp.transpose(dec_out, (1, 0, 2))                                     # (B,Tq,2H)

    pointer_align_scores = pointer_attention(dec_out, memory_bank)                  # (B,Tq,Ts)
    return pointer_align_scores


# --------------------------------------------------------------------------------------
if __name__ == "__main__":
    # small synthetic config (args)
    B = 2
    vocab_size = 50
    n_pos = 10
    word_dim = 32
    hidden_size = 32
    num_layers = 1
    tokenize_max_len = 8
    columns_token_max_len = 8
    cells_token_max_len = 8
    n_col_markers = 3
    n_cell_markers = 3

    key = jax.random.PRNGKey(0)
    kp, k1, k2, k3, k4 = jax.random.split(key, 5)
    params = init_params(kp, vocab_size, n_pos, word_dim, hidden_size, num_layers)

    tokenize = jax.random.randint(k1, (B, tokenize_max_len), 0, vocab_size, dtype=jnp.int32)
    tokenize_len = jnp.full((B,), tokenize_max_len, jnp.int32)
    pos_tag = jax.random.randint(k2, (B, tokenize_max_len), 0, n_pos, dtype=jnp.int32)
    columns_split = jax.random.randint(k3, (B, columns_token_max_len), 0, vocab_size, dtype=jnp.int32)
    columns_split_len = jnp.full((B,), columns_token_max_len, jnp.int32)
    columns_split_marker = jnp.tile(jnp.array([[0, 3, 7]], jnp.int32), (B, 1))
    columns_split_marker_len = jnp.full((B,), n_col_markers, jnp.int32)
    cells_split = jax.random.randint(k4, (B, cells_token_max_len), 0, vocab_size, dtype=jnp.int32)
    cells_split_len = jnp.full((B,), cells_token_max_len, jnp.int32)
    cells_split_marker = jnp.tile(jnp.array([[0, 4, 7]], jnp.int32), (B, 1))
    cells_split_marker_len = jnp.full((B,), n_cell_markers, jnp.int32)

    inputs = [
        (tokenize, tokenize_len),
        (pos_tag, None),
        (columns_split, columns_split_len),
        (columns_split_marker, columns_split_marker_len),
        (cells_split, cells_split_len),
        (cells_split_marker, cells_split_marker_len),
    ]

    scores = baseline_forward(params, inputs, hidden_size, num_layers)
    scores = jax.block_until_ready(scores)
    expected_src = tokenize_max_len + n_col_markers + n_cell_markers
    assert scores.shape == (B, tokenize_max_len, expected_src), scores.shape
    assert bool(jnp.all(jnp.isfinite(scores)))
    print("KERNEL_OK")
</pallas_src>

<mosaic_0001>
module attributes {stable_mosaic.version = 11 : i64} {
  func.func @_bilstm_seq_kernel(%arg0: i32, %arg1: memref<8x2x128xf32, #tpu.memory_space<vmem>>, %arg2: memref<8x2x128xf32, #tpu.memory_space<vmem>>, %arg3: memref<2x32xf32, #tpu.memory_space<vmem>>, %arg4: memref<2x32xf32, #tpu.memory_space<vmem>>, %arg5: memref<2x32xf32, #tpu.memory_space<vmem>>, %arg6: memref<2x32xf32, #tpu.memory_space<vmem>>, %arg7: memref<32x128xbf16, #tpu.memory_space<vmem>>, %arg8: memref<32x128xbf16, #tpu.memory_space<vmem>>, %arg9: memref<8x2x64xf32, #tpu.memory_space<vmem>>, %arg10: memref<2x32xf32, #tpu.memory_space<vmem>>, %arg11: memref<2x32xf32, #tpu.memory_space<vmem>>, %arg12: memref<2x32xf32, #tpu.memory_space<vmem>>, %arg13: memref<2x32xf32, #tpu.memory_space<vmem>>) attributes {dimension_semantics = [#tpu.dimension_semantics<arbitrary>], iteration_bounds = array<i64: 1>, scalar_prefetch = 0 : i64, scratch_operands = 0 : i64, tpu.core_type = #tpu.core_type<tc>, window_params = [{pipeline_mode = #tpu.pipeline_mode<synchronous>, transform_indices = @transform_0, window_bounds = array<i64: 8, 2, 128>}, {pipeline_mode = #tpu.pipeline_mode<synchronous>, transform_indices = @transform_1, window_bounds = array<i64: 8, 2, 128>}, {pipeline_mode = #tpu.pipeline_mode<synchronous>, transform_indices = @transform_2, window_bounds = array<i64: 2, 32>}, {pipeline_mode = #tpu.pipeline_mode<synchronous>, transform_indices = @transform_3, window_bounds = array<i64: 2, 32>}, {pipeline_mode = #tpu.pipeline_mode<synchronous>, transform_indices = @transform_4, window_bounds = array<i64: 2, 32>}, {pipeline_mode = #tpu.pipeline_mode<synchronous>, transform_indices = @transform_5, window_bounds = array<i64: 2, 32>}, {pipeline_mode = #tpu.pipeline_mode<synchronous>, transform_indices = @transform_6, window_bounds = array<i64: 32, 128>}, {pipeline_mode = #tpu.pipeline_mode<synchronous>, transform_indices = @transform_7, window_bounds = array<i64: 32, 128>}, {pipeline_mode = #tpu.pipeline_mode<synchronous>, transform_indices = @transform_8, window_bounds = array<i64: 8, 2, 64>}, {pipeline_mode = #tpu.pipeline_mode<synchronous>, transform_indices = @transform_9, window_bounds = array<i64: 2, 32>}, {pipeline_mode = #tpu.pipeline_mode<synchronous>, transform_indices = @transform_10, window_bounds = array<i64: 2, 32>}, {pipeline_mode = #tpu.pipeline_mode<synchronous>, transform_indices = @transform_11, window_bounds = array<i64: 2, 32>}, {pipeline_mode = #tpu.pipeline_mode<synchronous>, transform_indices = @transform_12, window_bounds = array<i64: 2, 32>}]} {
    %c0 = arith.constant 0 : index
    %c0_0 = arith.constant 0 : index
    %0 = vector.load %arg7[%c0, %c0_0] : memref<32x128xbf16, #tpu.memory_space<vmem>>, vector<32x128xbf16>
    %c0_1 = arith.constant 0 : index
    %c0_2 = arith.constant 0 : index
    %1 = vector.load %arg8[%c0_1, %c0_2] : memref<32x128xbf16, #tpu.memory_space<vmem>>, vector<32x128xbf16>
    %c0_3 = arith.constant 0 : index
    %c0_4 = arith.constant 0 : index
    %2 = vector.load %arg3[%c0_3, %c0_4] : memref<2x32xf32, #tpu.memory_space<vmem>>, vector<2x32xf32>
    %c0_5 = arith.constant 0 : index
    %c0_6 = arith.constant 0 : index
    %3 = vector.load %arg4[%c0_5, %c0_6] : memref<2x32xf32, #tpu.memory_space<vmem>>, vector<2x32xf32>
    %c0_7 = arith.constant 0 : index
    %c0_8 = arith.constant 0 : index
    %4 = vector.load %arg5[%c0_7, %c0_8] : memref<2x32xf32, #tpu.memory_space<vmem>>, vector<2x32xf32>
    %c0_9 = arith.constant 0 : index
    %c0_10 = arith.constant 0 : index
    %5 = vector.load %arg6[%c0_9, %c0_10] : memref<2x32xf32, #tpu.memory_space<vmem>>, vector<2x32xf32>
    %c0_i32 = arith.constant 0 : i32
    %c7_i32 = arith.constant 7 : i32
    %6 = arith.subi %c7_i32, %c0_i32 : i32
    %7 = arith.index_cast %c0_i32 : i32 to index
    %c0_11 = arith.constant 0 : index
    %c0_12 = arith.constant 0 : index
    %8 = vector.load %arg1[%7, %c0_11, %c0_12] : memref<8x2x128xf32, #tpu.memory_space<vmem>>, vector<1x2x128xf32>
    %9 = vector.shape_cast %8 : vector<1x2x128xf32> to vector<2x128xf32>
    %10 = arith.truncf %2 : vector<2x32xf32> to vector<2x32xbf16>
    %cst = arith.constant dense<0.000000e+00> : vector<2x128xf32>
    %11 = tpu.matmul %10, %0, %cst {dimension_numbers = #tpu.dot_dimension_numbers<[1], [0], [0], [1], [0, 0, 1, 1], [], []>} : vector<2x32xbf16>, vector<32x128xbf16>, vector<2x128xf32> -> vector<2x128xf32>
    %12 = arith.addf %9, %11 : vector<2x128xf32>
    %13 = arith.index_cast %6 : i32 to index
    %c0_13 = arith.constant 0 : index
    %c0_14 = arith.constant 0 : index
    %14 = vector.load %arg2[%13, %c0_13, %c0_14] : memref<8x2x128xf32, #tpu.memory_space<vmem>>, vector<1x2x128xf32>
    %15 = vector.shape_cast %14 : vector<1x2x128xf32> to vector<2x128xf32>
    %16 = arith.truncf %4 : vector<2x32xf32> to vector<2x32xbf16>
    %cst_15 = arith.constant dense<0.000000e+00> : vector<2x128xf32>
    %17 = tpu.matmul %16, %1, %cst_15 {dimension_numbers = #tpu.dot_dimension_numbers<[1], [0], [0], [1], [0, 0, 1, 1], [], []>} : vector<2x32xbf16>, vector<32x128xbf16>, vector<2x128xf32> -> vector<2x128xf32>
    %18 = arith.addf %15, %17 : vector<2x128xf32>
    %19 = vector.extract_strided_slice %12 {offsets = [0, 0], sizes = [2, 32], strides = [1, 1]} : vector<2x128xf32> to vector<2x32xf32>
    %20 = arith.negf %19 : vector<2x32xf32>
    %21 = math.exp %20 : vector<2x32xf32>
    %cst_16 = arith.constant 1.000000e+00 : f32
    %22 = vector.broadcast %cst_16 : f32 to vector<2x32xf32>
    %23 = arith.addf %22, %21 : vector<2x32xf32>
    %24 = arith.divf %22, %23 : vector<2x32xf32>
    %25 = vector.extract_strided_slice %12 {offsets = [0, 32], sizes = [2, 32], strides = [1, 1]} : vector<2x128xf32> to vector<2x32xf32>
    %26 = arith.negf %25 : vector<2x32xf32>
    %27 = math.exp %26 : vector<2x32xf32>
    %cst_17 = arith.constant 1.000000e+00 : f32
    %28 = vector.broadcast %cst_17 : f32 to vector<2x32xf32>
    %29 = arith.addf %28, %27 : vector<2x32xf32>
    %30 = arith.divf %28, %29 : vector<2x32xf32>
    %31 = vector.extract_strided_slice %12 {offsets = [0, 64], sizes = [2, 32], strides = [1, 1]} : vector<2x128xf32> to vector<2x32xf32>
    %32 = math.tanh %31 : vector<2x32xf32>
    %33 = vector.extract_strided_slice %12 {offsets = [0, 96], sizes = [2, 32], strides = [1, 1]} : vector<2x128xf32> to vector<2x32xf32>
    %34 = arith.negf %33 : vector<2x32xf32>
    %35 = math.exp %34 : vector<2x32xf32>
    %cst_18 = arith.constant 1.000000e+00 : f32
    %36 = vector.broadcast %cst_18 : f32 to vector<2x32xf32>
    %37 = arith.addf %36, %35 : vector<2x32xf32>
    %38 = arith.divf %36, %37 : vector<2x32xf32>
    %39 = arith.mulf %30, %3 : vector<2x32xf32>
    %40 = arith.mulf %24, %32 : vector<2x32xf32>
    %41 = arith.addf %39, %40 : vector<2x32xf32>
    %42 = math.tanh %41 : vector<2x32xf32>
    %43 = arith.mulf %38, %42 : vector<2x32xf32>
    %44 = vector.extract_strided_slice %18 {offsets = [0, 0], sizes = [2, 32], strides = [1, 1]} : vector<2x128xf32> to vector<2x32xf32>
    %45 = arith.negf %44 : vector<2x32xf32>
    %46 = math.exp %45 : vector<2x32xf32>
    %cst_19 = arith.constant 1.000000e+00 : f32
    %47 = vector.broadcast %cst_19 : f32 to vector<2x32xf32>
    %48 = arith.addf %47, %46 : vector<2x32xf32>
    %49 = arith.divf %47, %48 : vector<2x32xf32>
    %50 = vector.extract_strided_slice %18 {offsets = [0, 32], sizes = [2, 32], strides = [1, 1]} : vector<2x128xf32> to vector<2x32xf32>
    %51 = arith.negf %50 : vector<2x32xf32>
    %52 = math.exp %51 : vector<2x32xf32>
    %cst_20 = arith.constant 1.000000e+00 : f32
    %53 = vector.broadcast %cst_20 : f32 to vector<2x32xf32>
    %54 = arith.addf %53, %52 : vector<2x32xf32>
    %55 = arith.divf %53, %54 : vector<2x32xf32>
    %56 = vector.extract_strided_slice %18 {offsets = [0, 64], sizes = [2, 32], strides = [1, 1]} : vector<2x128xf32> to vector<2x32xf32>
    %57 = math.tanh %56 : vector<2x32xf32>
    %58 = vector.extract_strided_slice %18 {offsets = [0, 96], sizes = [2, 32], strides = [1, 1]} : vector<2x128xf32> to vector<2x32xf32>
    %59 = arith.negf %58 : vector<2x32xf32>
    %60 = math.exp %59 : vector<2x32xf32>
    %cst_21 = arith.constant 1.000000e+00 : f32
    %61 = vector.broadcast %cst_21 : f32 to vector<2x32xf32>
    %62 = arith.addf %61, %60 : vector<2x32xf32>
    %63 = arith.divf %61, %62 : vector<2x32xf32>
    %64 = arith.mulf %55, %5 : vector<2x32xf32>
    %65 = arith.mulf %49, %57 : vector<2x32xf32>
    %66 = arith.addf %64, %65 : vector<2x32xf32>
    %67 = math.tanh %66 : vector<2x32xf32>
    %68 = arith.mulf %63, %67 : vector<2x32xf32>
    %69 = arith.index_cast %c0_i32 : i32 to index
    %c0_22 = arith.constant 0 : index
    %c0_23 = arith.constant 0 : index
    %70 = vector.load %arg9[%69, %c0_22, %c0_23] : memref<8x2x64xf32, #tpu.memory_space<vmem>>, vector<1x2x32xf32>
    %71 = vector.shape_cast %70 : vector<1x2x32xf32> to vector<2x32xf32>
    %72 = vector.shape_cast %43 : vector<2x32xf32> to vector<1x2x32xf32>
    tpu.vector_store %arg9[%69, %c0_22, %c0_23], %72 {strides = array<i32>} : memref<8x2x64xf32, #tpu.memory_space<vmem>>, vector<1x2x32xf32>,
    %73 = arith.index_cast %6 : i32 to index
    %c0_24 = arith.constant 0 : index
    %c32 = arith.constant 32 : index
    %74 = vector.load %arg9[%73, %c0_24, %c32] : memref<8x2x64xf32, #tpu.memory_space<vmem>>, vector<1x2x32xf32>
    %75 = vector.shape_cast %74 : vector<1x2x32xf32> to vector<2x32xf32>
    %76 = vector.shape_cast %68 : vector<2x32xf32> to vector<1x2x32xf32>
    tpu.vector_store %arg9[%73, %c0_24, %c32], %76 {strides = array<i32>} : memref<8x2x64xf32, #tpu.memory_space<vmem>>, vector<1x2x32xf32>,
    %c1_i32 = arith.constant 1 : i32
    %c7_i32_25 = arith.constant 7 : i32
    %77 = arith.subi %c7_i32_25, %c1_i32 : i32
    %78 = arith.index_cast %c1_i32 : i32 to index
    %c0_26 = arith.constant 0 : index
    %c0_27 = arith.constant 0 : index
    %79 = vector.load %arg1[%78, %c0_26, %c0_27] : memref<8x2x128xf32, #tpu.memory_space<vmem>>, vector<1x2x128xf32>
    %80 = vector.shape_cast %79 : vector<1x2x128xf32> to vector<2x128xf32>
    %81 = arith.truncf %43 : vector<2x32xf32> to vector<2x32xbf16>
    %cst_28 = arith.constant dense<0.000000e+00> : vector<2x128xf32>
    %82 = tpu.matmul %81, %0, %cst_28 {dimension_numbers = #tpu.dot_dimension_numbers<[1], [0], [0], [1], [0, 0, 1, 1], [], []>} : vector<2x32xbf16>, vector<32x128xbf16>, vector<2x128xf32> -> vector<2x128xf32>
    %83 = arith.addf %80, %82 : vector<2x128xf32>
    %84 = arith.index_cast %77 : i32 to index
    %c0_29 = arith.constant 0 : index
    %c0_30 = arith.constant 0 : index
    %85 = vector.load %arg2[%84, %c0_29, %c0_30] : memref<8x2x128xf32, #tpu.memory_space<vmem>>, vector<1x2x128xf32>
    %86 = vector.shape_cast %85 : vector<1x2x128xf32> to vector<2x128xf32>
    %87 = arith.truncf %68 : vector<2x32xf32> to vector<2x32xbf16>
    %cst_31 = arith.constant dense<0.000000e+00> : vector<2x128xf32>
    %88 = tpu.matmul %87, %1, %cst_31 {dimension_numbers = #tpu.dot_dimension_numbers<[1], [0], [0], [1], [0, 0, 1, 1], [], []>} : vector<2x32xbf16>, vector<32x128xbf16>, vector<2x128xf32> -> vector<2x128xf32>
    %89 = arith.addf %86, %88 : vector<2x128xf32>
    %90 = vector.extract_strided_slice %83 {offsets = [0, 0], sizes = [2, 32], strides = [1, 1]} : vector<2x128xf32> to vector<2x32xf32>
    %91 = arith.negf %90 : vector<2x32xf32>
    %92 = math.exp %91 : vector<2x32xf32>
    %cst_32 = arith.constant 1.000000e+00 : f32
    %93 = vector.broadcast %cst_32 : f32 to vector<2x32xf32>
    %94 = arith.addf %93, %92 : vector<2x32xf32>
    %95 = arith.divf %93, %94 : vector<2x32xf32>
    %96 = vector.extract_strided_slice %83 {offsets = [0, 32], sizes = [2, 32], strides = [1, 1]} : vector<2x128xf32> to vector<2x32xf32>
    %97 = arith.negf %96 : vector<2x32xf32>
    %98 = math.exp %97 : vector<2x32xf32>
    %cst_33 = arith.constant 1.000000e+00 : f32
    %99 = vector.broadcast %cst_33 : f32 to vector<2x32xf32>
    %100 = arith.addf %99, %98 : vector<2x32xf32>
    %101 = arith.divf %99, %100 : vector<2x32xf32>
    %102 = vector.extract_strided_slice %83 {offsets = [0, 64], sizes = [2, 32], strides = [1, 1]} : vector<2x128xf32> to vector<2x32xf32>
    %103 = math.tanh %102 : vector<2x32xf32>
    %104 = vector.extract_strided_slice %83 {offsets = [0, 96], sizes = [2, 32], strides = [1, 1]} : vector<2x128xf32> to vector<2x32xf32>
    %105 = arith.negf %104 : vector<2x32xf32>
    %106 = math.exp %105 : vector<2x32xf32>
    %cst_34 = arith.constant 1.000000e+00 : f32
    %107 = vector.broadcast %cst_34 : f32 to vector<2x32xf32>
    %108 = arith.addf %107, %106 : vector<2x32xf32>
    %109 = arith.divf %107, %108 : vector<2x32xf32>
    %110 = arith.mulf %101, %41 : vector<2x32xf32>
    %111 = arith.mulf %95, %103 : vector<2x32xf32>
    %112 = arith.addf %110, %111 : vector<2x32xf32>
    %113 = math.tanh %112 : vector<2x32xf32>
    %114 = arith.mulf %109, %113 : vector<2x32xf32>
    %115 = vector.extract_strided_slice %89 {offsets = [0, 0], sizes = [2, 32], strides = [1, 1]} : vector<2x128xf32> to vector<2x32xf32>
    %116 = arith.negf %115 : vector<2x32xf32>
    %117 = math.exp %116 : vector<2x32xf32>
    %cst_35 = arith.constant 1.000000e+00 : f32
    %118 = vector.broadcast %cst_35 : f32 to vector<2x32xf32>
    %119 = arith.addf %118, %117 : vector<2x32xf32>
    %120 = arith.divf %118, %119 : vector<2x32xf32>
    %121 = vector.extract_strided_slice %89 {offsets = [0, 32], sizes = [2, 32], strides = [1, 1]} : vector<2x128xf32> to vector<2x32xf32>
    %122 = arith.negf %121 : vector<2x32xf32>
    %123 = math.exp %122 : vector<2x32xf32>
    %cst_36 = arith.constant 1.000000e+00 : f32
    %124 = vector.broadcast %cst_36 : f32 to vector<2x32xf32>
    %125 = arith.addf %124, %123 : vector<2x32xf32>
    %126 = arith.divf %124, %125 : vector<2x32xf32>
    %127 = vector.extract_strided_slice %89 {offsets = [0, 64], sizes = [2, 32], strides = [1, 1]} : vector<2x128xf32> to vector<2x32xf32>
    %128 = math.tanh %127 : vector<2x32xf32>
    %129 = vector.extract_strided_slice %89 {offsets = [0, 96], sizes = [2, 32], strides = [1, 1]} : vector<2x128xf32> to vector<2x32xf32>
    %130 = arith.negf %129 : vector<2x32xf32>
    %131 = math.exp %130 : vector<2x32xf32>
    %cst_37 = arith.constant 1.000000e+00 : f32
    %132 = vector.broadcast %cst_37 : f32 to vector<2x32xf32>
    %133 = arith.addf %132, %131 : vector<2x32xf32>
    %134 = arith.divf %132, %133 : vector<2x32xf32>
    %135 = arith.mulf %126, %66 : vector<2x32xf32>
    %136 = arith.mulf %120, %128 : vector<2x32xf32>
    %137 = arith.addf %135, %136 : vector<2x32xf32>
    %138 = math.tanh %137 : vector<2x32xf32>
    %139 = arith.mulf %134, %138 : vector<2x32xf32>
    %140 = arith.index_cast %c1_i32 : i32 to index
    %c0_38 = arith.constant 0 : index
    %c0_39 = arith.constant 0 : index
    %141 = vector.load %arg9[%140, %c0_38, %c0_39] : memref<8x2x64xf32, #tpu.memory_space<vmem>>, vector<1x2x32xf32>
    %142 = vector.shape_cast %141 : vector<1x2x32xf32> to vector<2x32xf32>
    %143 = vector.shape_cast %114 : vector<2x32xf32> to vector<1x2x32xf32>
    tpu.vector_store %arg9[%140, %c0_38, %c0_39], %143 {strides = array<i32>} : memref<8x2x64xf32, #tpu.memory_space<vmem>>, vector<1x2x32xf32>,
    %144 = arith.index_cast %77 : i32 to index
    %c0_40 = arith.constant 0 : index
    %c32_41 = arith.constant 32 : index
    %145 = vector.load %arg9[%144, %c0_40, %c32_41] : memref<8x2x64xf32, #tpu.memory_space<vmem>>, vector<1x2x32xf32>
    %146 = vector.shape_cast %145 : vector<1x2x32xf32> to vector<2x32xf32>
    %147 = vector.shape_cast %139 : vector<2x32xf32> to vector<1x2x32xf32>
    tpu.vector_store %arg9[%144, %c0_40, %c32_41], %147 {strides = array<i32>} : memref<8x2x64xf32, #tpu.memory_space<vmem>>, vector<1x2x32xf32>,
    %c2_i32 = arith.constant 2 : i32
    %c7_i32_42 = arith.constant 7 : i32
    %148 = arith.subi %c7_i32_42, %c2_i32 : i32
    %149 = arith.index_cast %c2_i32 : i32 to index
    %c0_43 = arith.constant 0 : index
    %c0_44 = arith.constant 0 : index
    %150 = vector.load %arg1[%149, %c0_43, %c0_44] : memref<8x2x128xf32, #tpu.memory_space<vmem>>, vector<1x2x128xf32>
    %151 = vector.shape_cast %150 : vector<1x2x128xf32> to vector<2x128xf32>
    %152 = arith.truncf %114 : vector<2x32xf32> to vector<2x32xbf16>
    %cst_45 = arith.constant dense<0.000000e+00> : vector<2x128xf32>
    %153 = tpu.matmul %152, %0, %cst_45 {dimension_numbers = #tpu.dot_dimension_numbers<[1], [0], [0], [1], [0, 0, 1, 1], [], []>} : vector<2x32xbf16>, vector<32x128xbf16>, vector<2x128xf32> -> vector<2x128xf32>
    %154 = arith.addf %151, %153 : vector<2x128xf32>
    %155 = arith.index_cast %148 : i32 to index
    %c0_46 = arith.constant 0 : index
    %c0_47 = arith.constant 0 : index
    %156 = vector.load %arg2[%155, %c0_46, %c0_47] : memref<8x2x128xf32, #tpu.memory_space<vmem>>, vector<1x2x128xf32>
    %157 = vector.shape_cast %156 : vector<1x2x128xf32> to vector<2x128xf32>
    %158 = arith.truncf %139 : vector<2x32xf32> to vector<2x32xbf16>
    %cst_48 = arith.constant dense<0.000000e+00> : vector<2x128xf32>
    %159 = tpu.matmul %158, %1, %cst_48 {dimension_numbers = #tpu.dot_dimension_numbers<[1], [0], [0], [1], [0, 0, 1, 1], [], []>} : vector<2x32xbf16>, vector<32x128xbf16>, vector<2x128xf32> -> vector<2x128xf32>
    %160 = arith.addf %157, %159 : vector<2x128xf32>
    %161 = vector.extract_strided_slice %154 {offsets = [0, 0], sizes = [2, 32], strides = [1, 1]} : vector<2x128xf32> to vector<2x32xf32>
    %162 = arith.negf %161 : vector<2x32xf32>
    %163 = math.exp %162 : vector<2x32xf32>
    %cst_49 = arith.constant 1.000000e+00 : f32
    %164 = vector.broadcast %cst_49 : f32 to vector<2x32xf32>
    %165 = arith.addf %164, %163 : vector<2x32xf32>
    %166 = arith.divf %164, %165 : vector<2x32xf32>
    %167 = vector.extract_strided_slice %154 {offsets = [0, 32], sizes = [2, 32], strides = [1, 1]} : vector<2x128xf32> to vector<2x32xf32>
    %168 = arith.negf %167 : vector<2x32xf32>
    %169 = math.exp %168 : vector<2x32xf32>
    %cst_50 = arith.constant 1.000000e+00 : f32
    %170 = vector.broadcast %cst_50 : f32 to vector<2x32xf32>
    %171 = arith.addf %170, %169 : vector<2x32xf32>
    %172 = arith.divf %170, %171 : vector<2x32xf32>
    %173 = vector.extract_strided_slice %154 {offsets = [0, 64], sizes = [2, 32], strides = [1, 1]} : vector<2x128xf32> to vector<2x32xf32>
    %174 = math.tanh %173 : vector<2x32xf32>
    %175 = vector.extract_strided_slice %154 {offsets = [0, 96], sizes = [2, 32], strides = [1, 1]} : vector<2x128xf32> to vector<2x32xf32>
    %176 = arith.negf %175 : vector<2x32xf32>
    %177 = math.exp %176 : vector<2x32xf32>
    %cst_51 = arith.constant 1.000000e+00 : f32
    %178 = vector.broadcast %cst_51 : f32 to vector<2x32xf32>
    %179 = arith.addf %178, %177 : vector<2x32xf32>
    %180 = arith.divf %178, %179 : vector<2x32xf32>
    %181 = arith.mulf %172, %112 : vector<2x32xf32>
    %182 = arith.mulf %166, %174 : vector<2x32xf32>
    %183 = arith.addf %181, %182 : vector<2x32xf32>
    %184 = math.tanh %183 : vector<2x32xf32>
    %185 = arith.mulf %180, %184 : vector<2x32xf32>
    %186 = vector.extract_strided_slice %160 {offsets = [0, 0], sizes = [2, 32], strides = [1, 1]} : vector<2x128xf32> to vector<2x32xf32>
    %187 = arith.negf %186 : vector<2x32xf32>
    %188 = math.exp %187 : vector<2x32xf32>
    %cst_52 = arith.constant 1.000000e+00 : f32
    %189 = vector.broadcast %cst_52 : f32 to vector<2x32xf32>
    %190 = arith.addf %189, %188 : vector<2x32xf32>
    %191 = arith.divf %189, %190 : vector<2x32xf32>
    %192 = vector.extract_strided_slice %160 {offsets = [0, 32], sizes = [2, 32], strides = [1, 1]} : vector<2x128xf32> to vector<2x32xf32>
    %193 = arith.negf %192 : vector<2x32xf32>
    %194 = math.exp %193 : vector<2x32xf32>
    %cst_53 = arith.constant 1.000000e+00 : f32
    %195 = vector.broadcast %cst_53 : f32 to vector<2x32xf32>
    %196 = arith.addf %195, %194 : vector<2x32xf32>
    %197 = arith.divf %195, %196 : vector<2x32xf32>
    %198 = vector.extract_strided_slice %160 {offsets = [0, 64], sizes = [2, 32], strides = [1, 1]} : vector<2x128xf32> to vector<2x32xf32>
    %199 = math.tanh %198 : vector<2x32xf32>
    %200 = vector.extract_strided_slice %160 {offsets = [0, 96], sizes = [2, 32], strides = [1, 1]} : vector<2x128xf32> to vector<2x32xf32>
    %201 = arith.negf %200 : vector<2x32xf32>
    %202 = math.exp %201 : vector<2x32xf32>
    %cst_54 = arith.constant 1.000000e+00 : f32
    %203 = vector.broadcast %cst_54 : f32 to vector<2x32xf32>
    %204 = arith.addf %203, %202 : vector<2x32xf32>
    %205 = arith.divf %203, %204 : vector<2x32xf32>
    %206 = arith.mulf %197, %137 : vector<2x32xf32>
    %207 = arith.mulf %191, %199 : vector<2x32xf32>
    %208 = arith.addf %206, %207 : vector<2x32xf32>
    %209 = math.tanh %208 : vector<2x32xf32>
    %210 = arith.mulf %205, %209 : vector<2x32xf32>
    %211 = arith.index_cast %c2_i32 : i32 to index
    %c0_55 = arith.constant 0 : index
    %c0_56 = arith.constant 0 : index
    %212 = vector.load %arg9[%211, %c0_55, %c0_56] : memref<8x2x64xf32, #tpu.memory_space<vmem>>, vector<1x2x32xf32>
    %213 = vector.shape_cast %212 : vector<1x2x32xf32> to vector<2x32xf32>
    %214 = vector.shape_cast %185 : vector<2x32xf32> to vector<1x2x32xf32>
    tpu.vector_store %arg9[%211, %c0_55, %c0_56], %214 {strides = array<i32>} : memref<8x2x64xf32, #tpu.memory_space<vmem>>, vector<1x2x32xf32>,
    %215 = arith.index_cast %148 : i32 to index
    %c0_57 = arith.constant 0 : index
    %c32_58 = arith.constant 32 : index
    %216 = vector.load %arg9[%215, %c0_57, %c32_58] : memref<8x2x64xf32, #tpu.memory_space<vmem>>, vector<1x2x32xf32>
    %217 = vector.shape_cast %216 : vector<1x2x32xf32> to vector<2x32xf32>
    %218 = vector.shape_cast %210 : vector<2x32xf32> to vector<1x2x32xf32>
    tpu.vector_store %arg9[%215, %c0_57, %c32_58], %218 {strides = array<i32>} : memref<8x2x64xf32, #tpu.memory_space<vmem>>, vector<1x2x32xf32>,
    %c3_i32 = arith.constant 3 : i32
    %c7_i32_59 = arith.constant 7 : i32
    %219 = arith.subi %c7_i32_59, %c3_i32 : i32
    %220 = arith.index_cast %c3_i32 : i32 to index
    %c0_60 = arith.constant 0 : index
    %c0_61 = arith.constant 0 : index
    %221 = vector.load %arg1[%220, %c0_60, %c0_61] : memref<8x2x128xf32, #tpu.memory_space<vmem>>, vector<1x2x128xf32>
    %222 = vector.shape_cast %221 : vector<1x2x128xf32> to vector<2x128xf32>
    %223 = arith.truncf %185 : vector<2x32xf32> to vector<2x32xbf16>
    %cst_62 = arith.constant dense<0.000000e+00> : vector<2x128xf32>
    %224 = tpu.matmul %223, %0, %cst_62 {dimension_numbers = #tpu.dot_dimension_numbers<[1], [0], [0], [1], [0, 0, 1, 1], [], []>} : vector<2x32xbf16>, vector<32x128xbf16>, vector<2x128xf32> -> vector<2x128xf32>
    %225 = arith.addf %222, %224 : vector<2x128xf32>
    %226 = arith.index_cast %219 : i32 to index
    %c0_63 = arith.constant 0 : index
    %c0_64 = arith.constant 0 : index
    %227 = vector.load %arg2[%226, %c0_63, %c0_64] : memref<8x2x128xf32, #tpu.memory_space<vmem>>, vector<1x2x128xf32>
    %228 = vector.shape_cast %227 : vector<1x2x128xf32> to vector<2x128xf32>
    %229 = arith.truncf %210 : vector<2x32xf32> to vector<2x32xbf16>
    %cst_65 = arith.constant dense<0.000000e+00> : vector<2x128xf32>
    %230 = tpu.matmul %229, %1, %cst_65 {dimension_numbers = #tpu.dot_dimension_numbers<[1], [0], [0], [1], [0, 0, 1, 1], [], []>} : vector<2x32xbf16>, vector<32x128xbf16>, vector<2x128xf32> -> vector<2x128xf32>
    %231 = arith.addf %228, %230 : vector<2x128xf32>
    %232 = vector.extract_strided_slice %225 {offsets = [0, 0], sizes = [2, 32], strides = [1, 1]} : vector<2x128xf32> to vector<2x32xf32>
    %233 = arith.negf %232 : vector<2x32xf32>
    %234 = math.exp %233 : vector<2x32xf32>
    %cst_66 = arith.constant 1.000000e+00 : f32
    %235 = vector.broadcast %cst_66 : f32 to vector<2x32xf32>
    %236 = arith.addf %235, %234 : vector<2x32xf32>
    %237 = arith.divf %235, %236 : vector<2x32xf32>
    %238 = vector.extract_strided_slice %225 {offsets = [0, 32], sizes = [2, 32], strides = [1, 1]} : vector<2x128xf32> to vector<2x32xf32>
    %239 = arith.negf %238 : vector<2x32xf32>
    %240 = math.exp %239 : vector<2x32xf32>
    %cst_67 = arith.constant 1.000000e+00 : f32
    %241 = vector.broadcast %cst_67 : f32 to vector<2x32xf32>
    %242 = arith.addf %241, %240 : vector<2x32xf32>
    %243 = arith.divf %241, %242 : vector<2x32xf32>
    %244 = vector.extract_strided_slice %225 {offsets = [0, 64], sizes = [2, 32], strides = [1, 1]} : vector<2x128xf32> to vector<2x32xf32>
    %245 = math.tanh %244 : vector<2x32xf32>
    %246 = vector.extract_strided_slice %225 {offsets = [0, 96], sizes = [2, 32], strides = [1, 1]} : vector<2x128xf32> to vector<2x32xf32>
    %247 = arith.negf %246 : vector<2x32xf32>
    %248 = math.exp %247 : vector<2x32xf32>
    %cst_68 = arith.constant 1.000000e+00 : f32
    %249 = vector.broadcast %cst_68 : f32 to vector<2x32xf32>
    %250 = arith.addf %249, %248 : vector<2x32xf32>
    %251 = arith.divf %249, %250 : vector<2x32xf32>
    %252 = arith.mulf %243, %183 : vector<2x32xf32>
    %253 = arith.mulf %237, %245 : vector<2x32xf32>
    %254 = arith.addf %252, %253 : vector<2x32xf32>
    %255 = math.tanh %254 : vector<2x32xf32>
    %256 = arith.mulf %251, %255 : vector<2x32xf32>
    %257 = vector.extract_strided_slice %231 {offsets = [0, 0], sizes = [2, 32], strides = [1, 1]} : vector<2x128xf32> to vector<2x32xf32>
    %258 = arith.negf %257 : vector<2x32xf32>
    %259 = math.exp %258 : vector<2x32xf32>
    %cst_69 = arith.constant 1.000000e+00 : f32
    %260 = vector.broadcast %cst_69 : f32 to vector<2x32xf32>
    %261 = arith.addf %260, %259 : vector<2x32xf32>
    %262 = arith.divf %260, %261 : vector<2x32xf32>
    %263 = vector.extract_strided_slice %231 {offsets = [0, 32], sizes = [2, 32], strides = [1, 1]} : vector<2x128xf32> to vector<2x32xf32>
    %264 = arith.negf %263 : vector<2x32xf32>
    %265 = math.exp %264 : vector<2x32xf32>
    %cst_70 = arith.constant 1.000000e+00 : f32
    %266 = vector.broadcast %cst_70 : f32 to vector<2x32xf32>
    %267 = arith.addf %266, %265 : vector<2x32xf32>
    %268 = arith.divf %266, %267 : vector<2x32xf32>
    %269 = vector.extract_strided_slice %231 {offsets = [0, 64], sizes = [2, 32], strides = [1, 1]} : vector<2x128xf32> to vector<2x32xf32>
    %270 = math.tanh %269 : vector<2x32xf32>
    %271 = vector.extract_strided_slice %231 {offsets = [0, 96], sizes = [2, 32], strides = [1, 1]} : vector<2x128xf32> to vector<2x32xf32>
    %272 = arith.negf %271 : vector<2x32xf32>
    %273 = math.exp %272 : vector<2x32xf32>
    %cst_71 = arith.constant 1.000000e+00 : f32
    %274 = vector.broadcast %cst_71 : f32 to vector<2x32xf32>
    %275 = arith.addf %274, %273 : vector<2x32xf32>
    %276 = arith.divf %274, %275 : vector<2x32xf32>
    %277 = arith.mulf %268, %208 : vector<2x32xf32>
    %278 = arith.mulf %262, %270 : vector<2x32xf32>
    %279 = arith.addf %277, %278 : vector<2x32xf32>
    %280 = math.tanh %279 : vector<2x32xf32>
    %281 = arith.mulf %276, %280 : vector<2x32xf32>
    %282 = arith.index_cast %c3_i32 : i32 to index
    %c0_72 = arith.constant 0 : index
    %c0_73 = arith.constant 0 : index
    %283 = vector.load %arg9[%282, %c0_72, %c0_73] : memref<8x2x64xf32, #tpu.memory_space<vmem>>, vector<1x2x32xf32>
    %284 = vector.shape_cast %283 : vector<1x2x32xf32> to vector<2x32xf32>
    %285 = vector.shape_cast %256 : vector<2x32xf32> to vector<1x2x32xf32>
    tpu.vector_store %arg9[%282, %c0_72, %c0_73], %285 {strides = array<i32>} : memref<8x2x64xf32, #tpu.memory_space<vmem>>, vector<1x2x32xf32>,
    %286 = arith.index_cast %219 : i32 to index
    %c0_74 = arith.constant 0 : index
    %c32_75 = arith.constant 32 : index
    %287 = vector.load %arg9[%286, %c0_74, %c32_75] : memref<8x2x64xf32, #tpu.memory_space<vmem>>, vector<1x2x32xf32>
    %288 = vector.shape_cast %287 : vector<1x2x32xf32> to vector<2x32xf32>
    %289 = vector.shape_cast %281 : vector<2x32xf32> to vector<1x2x32xf32>
    tpu.vector_store %arg9[%286, %c0_74, %c32_75], %289 {strides = array<i32>} : memref<8x2x64xf32, #tpu.memory_space<vmem>>, vector<1x2x32xf32>,
    %c4_i32 = arith.constant 4 : i32
    %c7_i32_76 = arith.constant 7 : i32
    %290 = arith.subi %c7_i32_76, %c4_i32 : i32
    %291 = arith.index_cast %c4_i32 : i32 to index
    %c0_77 = arith.constant 0 : index
    %c0_78 = arith.constant 0 : index
    %292 = vector.load %arg1[%291, %c0_77, %c0_78] : memref<8x2x128xf32, #tpu.memory_space<vmem>>, vector<1x2x128xf32>
    %293 = vector.shape_cast %292 : vector<1x2x128xf32> to vector<2x128xf32>
    %294 = arith.truncf %256 : vector<2x32xf32> to vector<2x32xbf16>
    %cst_79 = arith.constant dense<0.000000e+00> : vector<2x128xf32>
    %295 = tpu.matmul %294, %0, %cst_79 {dimension_numbers = #tpu.dot_dimension_numbers<[1], [0], [0], [1], [0, 0, 1, 1], [], []>} : vector<2x32xbf16>, vector<32x128xbf16>, vector<2x128xf32> -> vector<2x128xf32>
    %296 = arith.addf %293, %295 : vector<2x128xf32>
    %297 = arith.index_cast %290 : i32 to index
    %c0_80 = arith.constant 0 : index
    %c0_81 = arith.constant 0 : index
    %298 = vector.load %arg2[%297, %c0_80, %c0_81] : memref<8x2x128xf32, #tpu.memory_space<vmem>>, vector<1x2x128xf32>
    %299 = vector.shape_cast %298 : vector<1x2x128xf32> to vector<2x128xf32>
    %300 = arith.truncf %281 : vector<2x32xf32> to vector<2x32xbf16>
    %cst_82 = arith.constant dense<0.000000e+00> : vector<2x128xf32>
    %301 = tpu.matmul %300, %1, %cst_82 {dimension_numbers = #tpu.dot_dimension_numbers<[1], [0], [0], [1], [0, 0, 1, 1], [], []>} : vector<2x32xbf16>, vector<32x128xbf16>, vector<2x128xf32> -> vector<2x128xf32>
    %302 = arith.addf %299, %301 : vector<2x128xf32>
    %303 = vector.extract_strided_slice %296 {offsets = [0, 0], sizes = [2, 32], strides = [1, 1]} : vector<2x128xf32> to vector<2x32xf32>
    %304 = arith.negf %303 : vector<2x32xf32>
    %305 = math.exp %304 : vector<2x32xf32>
    %cst_83 = arith.constant 1.000000e+00 : f32
    %306 = vector.broadcast %cst_83 : f32 to vector<2x32xf32>
    %307 = arith.addf %306, %305 : vector<2x32xf32>
    %308 = arith.divf %306, %307 : vector<2x32xf32>
    %309 = vector.extract_strided_slice %296 {offsets = [0, 32], sizes = [2, 32], strides = [1, 1]} : vector<2x128xf32> to vector<2x32xf32>
    %310 = arith.negf %309 : vector<2x32xf32>
    %311 = math.exp %310 : vector<2x32xf32>
    %cst_84 = arith.constant 1.000000e+00 : f32
    %312 = vector.broadcast %cst_84 : f32 to vector<2x32xf32>
    %313 = arith.addf %312, %311 : vector<2x32xf32>
    %314 = arith.divf %312, %313 : vector<2x32xf32>
    %315 = vector.extract_strided_slice %296 {offsets = [0, 64], sizes = [2, 32], strides = [1, 1]} : vector<2x128xf32> to vector<2x32xf32>
    %316 = math.tanh %315 : vector<2x32xf32>
    %317 = vector.extract_strided_slice %296 {offsets = [0, 96], sizes = [2, 32], strides = [1, 1]} : vector<2x128xf32> to vector<2x32xf32>
    %318 = arith.negf %317 : vector<2x32xf32>
    %319 = math.exp %318 : vector<2x32xf32>
    %cst_85 = arith.constant 1.000000e+00 : f32
    %320 = vector.broadcast %cst_85 : f32 to vector<2x32xf32>
    %321 = arith.addf %320, %319 : vector<2x32xf32>
    %322 = arith.divf %320, %321 : vector<2x32xf32>
    %323 = arith.mulf %314, %254 : vector<2x32xf32>
    %324 = arith.mulf %308, %316 : vector<2x32xf32>
    %325 = arith.addf %323, %324 : vector<2x32xf32>
    %326 = math.tanh %325 : vector<2x32xf32>
    %327 = arith.mulf %322, %326 : vector<2x32xf32>
    %328 = vector.extract_strided_slice %302 {offsets = [0, 0], sizes = [2, 32], strides = [1, 1]} : vector<2x128xf32> to vector<2x32xf32>
    %329 = arith.negf %328 : vector<2x32xf32>
    %330 = math.exp %329 : vector<2x32xf32>
    %cst_86 = arith.constant 1.000000e+00 : f32
    %331 = vector.broadcast %cst_86 : f32 to vector<2x32xf32>
    %332 = arith.addf %331, %330 : vector<2x32xf32>
    %333 = arith.divf %331, %332 : vector<2x32xf32>
    %334 = vector.extract_strided_slice %302 {offsets = [0, 32], sizes = [2, 32], strides = [1, 1]} : vector<2x128xf32> to vector<2x32xf32>
    %335 = arith.negf %334 : vector<2x32xf32>
    %336 = math.exp %335 : vector<2x32xf32>
    %cst_87 = arith.constant 1.000000e+00 : f32
    %337 = vector.broadcast %cst_87 : f32 to vector<2x32xf32>
    %338 = arith.addf %337, %336 : vector<2x32xf32>
    %339 = arith.divf %337, %338 : vector<2x32xf32>
    %340 = vector.extract_strided_slice %302 {offsets = [0, 64], sizes = [2, 32], strides = [1, 1]} : vector<2x128xf32> to vector<2x32xf32>
    %341 = math.tanh %340 : vector<2x32xf32>
    %342 = vector.extract_strided_slice %302 {offsets = [0, 96], sizes = [2, 32], strides = [1, 1]} : vector<2x128xf32> to vector<2x32xf32>
    %343 = arith.negf %342 : vector<2x32xf32>
    %344 = math.exp %343 : vector<2x32xf32>
    %cst_88 = arith.constant 1.000000e+00 : f32
    %345 = vector.broadcast %cst_88 : f32 to vector<2x32xf32>
    %346 = arith.addf %345, %344 : vector<2x32xf32>
    %347 = arith.divf %345, %346 : vector<2x32xf32>
    %348 = arith.mulf %339, %279 : vector<2x32xf32>
    %349 = arith.mulf %333, %341 : vector<2x32xf32>
    %350 = arith.addf %348, %349 : vector<2x32xf32>
    %351 = math.tanh %350 : vector<2x32xf32>
    %352 = arith.mulf %347, %351 : vector<2x32xf32>
    %353 = arith.index_cast %c4_i32 : i32 to index
    %c0_89 = arith.constant 0 : index
    %c0_90 = arith.constant 0 : index
    %354 = vector.load %arg9[%353, %c0_89, %c0_90] : memref<8x2x64xf32, #tpu.memory_space<vmem>>, vector<1x2x32xf32>
    %355 = vector.shape_cast %354 : vector<1x2x32xf32> to vector<2x32xf32>
    %356 = vector.shape_cast %327 : vector<2x32xf32> to vector<1x2x32xf32>
    tpu.vector_store %arg9[%353, %c0_89, %c0_90], %356 {strides = array<i32>} : memref<8x2x64xf32, #tpu.memory_space<vmem>>, vector<1x2x32xf32>,
    %357 = arith.index_cast %290 : i32 to index
    %c0_91 = arith.constant 0 : index
    %c32_92 = arith.constant 32 : index
    %358 = vector.load %arg9[%357, %c0_91, %c32_92] : memref<8x2x64xf32, #tpu.memory_space<vmem>>, vector<1x2x32xf32>
    %359 = vector.shape_cast %358 : vector<1x2x32xf32> to vector<2x32xf32>
    %360 = vector.shape_cast %352 : vector<2x32xf32> to vector<1x2x32xf32>
    tpu.vector_store %arg9[%357, %c0_91, %c32_92], %360 {strides = array<i32>} : memref<8x2x64xf32, #tpu.memory_space<vmem>>, vector<1x2x32xf32>,
    %c5_i32 = arith.constant 5 : i32
    %c7_i32_93 = arith.constant 7 : i32
    %361 = arith.subi %c7_i32_93, %c5_i32 : i32
    %362 = arith.index_cast %c5_i32 : i32 to index
    %c0_94 = arith.constant 0 : index
    %c0_95 = arith.constant 0 : index
    %363 = vector.load %arg1[%362, %c0_94, %c0_95] : memref<8x2x128xf32, #tpu.memory_space<vmem>>, vector<1x2x128xf32>
    %364 = vector.shape_cast %363 : vector<1x2x128xf32> to vector<2x128xf32>
    %365 = arith.truncf %327 : vector<2x32xf32> to vector<2x32xbf16>
    %cst_96 = arith.constant dense<0.000000e+00> : vector<2x128xf32>
    %366 = tpu.matmul %365, %0, %cst_96 {dimension_numbers = #tpu.dot_dimension_numbers<[1], [0], [0], [1], [0, 0, 1, 1], [], []>} : vector<2x32xbf16>, vector<32x128xbf16>, vector<2x128xf32> -> vector<2x128xf32>
    %367 = arith.addf %364, %366 : vector<2x128xf32>
    %368 = arith.index_cast %361 : i32 to index
    %c0_97 = arith.constant 0 : index
    %c0_98 = arith.constant 0 : index
    %369 = vector.load %arg2[%368, %c0_97, %c0_98] : memref<8x2x128xf32, #tpu.memory_space<vmem>>, vector<1x2x128xf32>
    %370 = vector.shape_cast %369 : vector<1x2x128xf32> to vector<2x128xf32>
    %371 = arith.truncf %352 : vector<2x32xf32> to vector<2x32xbf16>
    %cst_99 = arith.constant dense<0.000000e+00> : vector<2x128xf32>
    %372 = tpu.matmul %371, %1, %cst_99 {dimension_numbers = #tpu.dot_dimension_numbers<[1], [0], [0], [1], [0, 0, 1, 1], [], []>} : vector<2x32xbf16>, vector<32x128xbf16>, vector<2x128xf32> -> vector<2x128xf32>
    %373 = arith.addf %370, %372 : vector<2x128xf32>
    %374 = vector.extract_strided_slice %367 {offsets = [0, 0], sizes = [2, 32], strides = [1, 1]} : vector<2x128xf32> to vector<2x32xf32>
    %375 = arith.negf %374 : vector<2x32xf32>
    %376 = math.exp %375 : vector<2x32xf32>
    %cst_100 = arith.constant 1.000000e+00 : f32
    %377 = vector.broadcast %cst_100 : f32 to vector<2x32xf32>
    %378 = arith.addf %377, %376 : vector<2x32xf32>
    %379 = arith.divf %377, %378 : vector<2x32xf32>
    %380 = vector.extract_strided_slice %367 {offsets = [0, 32], sizes = [2, 32], strides = [1, 1]} : vector<2x128xf32> to vector<2x32xf32>
    %381 = arith.negf %380 : vector<2x32xf32>
    %382 = math.exp %381 : vector<2x32xf32>
    %cst_101 = arith.constant 1.000000e+00 : f32
    %383 = vector.broadcast %cst_101 : f32 to vector<2x32xf32>
    %384 = arith.addf %383, %382 : vector<2x32xf32>
    %385 = arith.divf %383, %384 : vector<2x32xf32>
    %386 = vector.extract_strided_slice %367 {offsets = [0, 64], sizes = [2, 32], strides = [1, 1]} : vector<2x128xf32> to vector<2x32xf32>
    %387 = math.tanh %386 : vector<2x32xf32>
    %388 = vector.extract_strided_slice %367 {offsets = [0, 96], sizes = [2, 32], strides = [1, 1]} : vector<2x128xf32> to vector<2x32xf32>
    %389 = arith.negf %388 : vector<2x32xf32>
    %390 = math.exp %389 : vector<2x32xf32>
    %cst_102 = arith.constant 1.000000e+00 : f32
    %391 = vector.broadcast %cst_102 : f32 to vector<2x32xf32>
    %392 = arith.addf %391, %390 : vector<2x32xf32>
    %393 = arith.divf %391, %392 : vector<2x32xf32>
    %394 = arith.mulf %385, %325 : vector<2x32xf32>
    %395 = arith.mulf %379, %387 : vector<2x32xf32>
    %396 = arith.addf %394, %395 : vector<2x32xf32>
    %397 = math.tanh %396 : vector<2x32xf32>
    %398 = arith.mulf %393, %397 : vector<2x32xf32>
    %399 = vector.extract_strided_slice %373 {offsets = [0, 0], sizes = [2, 32], strides = [1, 1]} : vector<2x128xf32> to vector<2x32xf32>
    %400 = arith.negf %399 : vector<2x32xf32>
    %401 = math.exp %400 : vector<2x32xf32>
    %cst_103 = arith.constant 1.000000e+00 : f32
    %402 = vector.broadcast %cst_103 : f32 to vector<2x32xf32>
    %403 = arith.addf %402, %401 : vector<2x32xf32>
    %404 = arith.divf %402, %403 : vector<2x32xf32>
    %405 = vector.extract_strided_slice %373 {offsets = [0, 32], sizes = [2, 32], strides = [1, 1]} : vector<2x128xf32> to vector<2x32xf32>
    %406 = arith.negf %405 : vector<2x32xf32>
    %407 = math.exp %406 : vector<2x32xf32>
    %cst_104 = arith.constant 1.000000e+00 : f32
    %408 = vector.broadcast %cst_104 : f32 to vector<2x32xf32>
    %409 = arith.addf %408, %407 : vector<2x32xf32>
    %410 = arith.divf %408, %409 : vector<2x32xf32>
    %411 = vector.extract_strided_slice %373 {offsets = [0, 64], sizes = [2, 32], strides = [1, 1]} : vector<2x128xf32> to vector<2x32xf32>
    %412 = math.tanh %411 : vector<2x32xf32>
    %413 = vector.extract_strided_slice %373 {offsets = [0, 96], sizes = [2, 32], strides = [1, 1]} : vector<2x128xf32> to vector<2x32xf32>
    %414 = arith.negf %413 : vector<2x32xf32>
    %415 = math.exp %414 : vector<2x32xf32>
    %cst_105 = arith.constant 1.000000e+00 : f32
    %416 = vector.broadcast %cst_105 : f32 to vector<2x32xf32>
    %417 = arith.addf %416, %415 : vector<2x32xf32>
    %418 = arith.divf %416, %417 : vector<2x32xf32>
    %419 = arith.mulf %410, %350 : vector<2x32xf32>
    %420 = arith.mulf %404, %412 : vector<2x32xf32>
    %421 = arith.addf %419, %420 : vector<2x32xf32>
    %422 = math.tanh %421 : vector<2x32xf32>
    %423 = arith.mulf %418, %422 : vector<2x32xf32>
    %424 = arith.index_cast %c5_i32 : i32 to index
    %c0_106 = arith.constant 0 : index
    %c0_107 = arith.constant 0 : index
    %425 = vector.load %arg9[%424, %c0_106, %c0_107] : memref<8x2x64xf32, #tpu.memory_space<vmem>>, vector<1x2x32xf32>
    %426 = vector.shape_cast %425 : vector<1x2x32xf32> to vector<2x32xf32>
    %427 = vector.shape_cast %398 : vector<2x32xf32> to vector<1x2x32xf32>
    tpu.vector_store %arg9[%424, %c0_106, %c0_107], %427 {strides = array<i32>} : memref<8x2x64xf32, #tpu.memory_space<vmem>>, vector<1x2x32xf32>,
    %428 = arith.index_cast %361 : i32 to index
    %c0_108 = arith.constant 0 : index
    %c32_109 = arith.constant 32 : index
    %429 = vector.load %arg9[%428, %c0_108, %c32_109] : memref<8x2x64xf32, #tpu.memory_space<vmem>>, vector<1x2x32xf32>
    %430 = vector.shape_cast %429 : vector<1x2x32xf32> to vector<2x32xf32>
    %431 = vector.shape_cast %423 : vector<2x32xf32> to vector<1x2x32xf32>
    tpu.vector_store %arg9[%428, %c0_108, %c32_109], %431 {strides = array<i32>} : memref<8x2x64xf32, #tpu.memory_space<vmem>>, vector<1x2x32xf32>,
    %c6_i32 = arith.constant 6 : i32
    %c7_i32_110 = arith.constant 7 : i32
    %432 = arith.subi %c7_i32_110, %c6_i32 : i32
    %433 = arith.index_cast %c6_i32 : i32 to index
    %c0_111 = arith.constant 0 : index
    %c0_112 = arith.constant 0 : index
    %434 = vector.load %arg1[%433, %c0_111, %c0_112] : memref<8x2x128xf32, #tpu.memory_space<vmem>>, vector<1x2x128xf32>
    %435 = vector.shape_cast %434 : vector<1x2x128xf32> to vector<2x128xf32>
    %436 = arith.truncf %398 : vector<2x32xf32> to vector<2x32xbf16>
    %cst_113 = arith.constant dense<0.000000e+00> : vector<2x128xf32>
    %437 = tpu.matmul %436, %0, %cst_113 {dimension_numbers = #tpu.dot_dimension_numbers<[1], [0], [0], [1], [0, 0, 1, 1], [], []>} : vector<2x32xbf16>, vector<32x128xbf16>, vector<2x128xf32> -> vector<2x128xf32>
    %438 = arith.addf %435, %437 : vector<2x128xf32>
    %439 = arith.index_cast %432 : i32 to index
    %c0_114 = arith.constant 0 : index
    %c0_115 = arith.constant 0 : index
    %440 = vector.load %arg2[%439, %c0_114, %c0_115] : memref<8x2x128xf32, #tpu.memory_space<vmem>>, vector<1x2x128xf32>
    %441 = vector.shape_cast %440 : vector<1x2x128xf32> to vector<2x128xf32>
    %442 = arith.truncf %423 : vector<2x32xf32> to vector<2x32xbf16>
    %cst_116 = arith.constant dense<0.000000e+00> : vector<2x128xf32>
    %443 = tpu.matmul %442, %1, %cst_116 {dimension_numbers = #tpu.dot_dimension_numbers<[1], [0], [0], [1], [0, 0, 1, 1], [], []>} : vector<2x32xbf16>, vector<32x128xbf16>, vector<2x128xf32> -> vector<2x128xf32>
    %444 = arith.addf %441, %443 : vector<2x128xf32>
    %445 = vector.extract_strided_slice %438 {offsets = [0, 0], sizes = [2, 32], strides = [1, 1]} : vector<2x128xf32> to vector<2x32xf32>
    %446 = arith.negf %445 : vector<2x32xf32>
    %447 = math.exp %446 : vector<2x32xf32>
    %cst_117 = arith.constant 1.000000e+00 : f32
    %448 = vector.broadcast %cst_117 : f32 to vector<2x32xf32>
    %449 = arith.addf %448, %447 : vector<2x32xf32>
    %450 = arith.divf %448, %449 : vector<2x32xf32>
    %451 = vector.extract_strided_slice %438 {offsets = [0, 32], sizes = [2, 32], strides = [1, 1]} : vector<2x128xf32> to vector<2x32xf32>
    %452 = arith.negf %451 : vector<2x32xf32>
    %453 = math.exp %452 : vector<2x32xf32>
    %cst_118 = arith.constant 1.000000e+00 : f32
    %454 = vector.broadcast %cst_118 : f32 to vector<2x32xf32>
    %455 = arith.addf %454, %453 : vector<2x32xf32>
    %456 = arith.divf %454, %455 : vector<2x32xf32>
    %457 = vector.extract_strided_slice %438 {offsets = [0, 64], sizes = [2, 32], strides = [1, 1]} : vector<2x128xf32> to vector<2x32xf32>
    %458 = math.tanh %457 : vector<2x32xf32>
    %459 = vector.extract_strided_slice %438 {offsets = [0, 96], sizes = [2, 32], strides = [1, 1]} : vector<2x128xf32> to vector<2x32xf32>
    %460 = arith.negf %459 : vector<2x32xf32>
    %461 = math.exp %460 : vector<2x32xf32>
    %cst_119 = arith.constant 1.000000e+00 : f32
    %462 = vector.broadcast %cst_119 : f32 to vector<2x32xf32>
    %463 = arith.addf %462, %461 : vector<2x32xf32>
    %464 = arith.divf %462, %463 : vector<2x32xf32>
    %465 = arith.mulf %456, %396 : vector<2x32xf32>
    %466 = arith.mulf %450, %458 : vector<2x32xf32>
    %467 = arith.addf %465, %466 : vector<2x32xf32>
    %468 = math.tanh %467 : vector<2x32xf32>
    %469 = arith.mulf %464, %468 : vector<2x32xf32>
    %470 = vector.extract_strided_slice %444 {offsets = [0, 0], sizes = [2, 32], strides = [1, 1]} : vector<2x128xf32> to vector<2x32xf32>
    %471 = arith.negf %470 : vector<2x32xf32>
    %472 = math.exp %471 : vector<2x32xf32>
    %cst_120 = arith.constant 1.000000e+00 : f32
    %473 = vector.broadcast %cst_120 : f32 to vector<2x32xf32>
    %474 = arith.addf %473, %472 : vector<2x32xf32>
    %475 = arith.divf %473, %474 : vector<2x32xf32>
    %476 = vector.extract_strided_slice %444 {offsets = [0, 32], sizes = [2, 32], strides = [1, 1]} : vector<2x128xf32> to vector<2x32xf32>
    %477 = arith.negf %476 : vector<2x32xf32>
    %478 = math.exp %477 : vector<2x32xf32>
    %cst_121 = arith.constant 1.000000e+00 : f32
    %479 = vector.broadcast %cst_121 : f32 to vector<2x32xf32>
    %480 = arith.addf %479, %478 : vector<2x32xf32>
    %481 = arith.divf %479, %480 : vector<2x32xf32>
    %482 = vector.extract_strided_slice %444 {offsets = [0, 64], sizes = [2, 32], strides = [1, 1]} : vector<2x128xf32> to vector<2x32xf32>
    %483 = math.tanh %482 : vector<2x32xf32>
    %484 = vector.extract_strided_slice %444 {offsets = [0, 96], sizes = [2, 32], strides = [1, 1]} : vector<2x128xf32> to vector<2x32xf32>
    %485 = arith.negf %484 : vector<2x32xf32>
    %486 = math.exp %485 : vector<2x32xf32>
    %cst_122 = arith.constant 1.000000e+00 : f32
    %487 = vector.broadcast %cst_122 : f32 to vector<2x32xf32>
    %488 = arith.addf %487, %486 : vector<2x32xf32>
    %489 = arith.divf %487, %488 : vector<2x32xf32>
    %490 = arith.mulf %481, %421 : vector<2x32xf32>
    %491 = arith.mulf %475, %483 : vector<2x32xf32>
    %492 = arith.addf %490, %491 : vector<2x32xf32>
    %493 = math.tanh %492 : vector<2x32xf32>
    %494 = arith.mulf %489, %493 : vector<2x32xf32>
    %495 = arith.index_cast %c6_i32 : i32 to index
    %c0_123 = arith.constant 0 : index
    %c0_124 = arith.constant 0 : index
    %496 = vector.load %arg9[%495, %c0_123, %c0_124] : memref<8x2x64xf32, #tpu.memory_space<vmem>>, vector<1x2x32xf32>
    %497 = vector.shape_cast %496 : vector<1x2x32xf32> to vector<2x32xf32>
    %498 = vector.shape_cast %469 : vector<2x32xf32> to vector<1x2x32xf32>
    tpu.vector_store %arg9[%495, %c0_123, %c0_124], %498 {strides = array<i32>} : memref<8x2x64xf32, #tpu.memory_space<vmem>>, vector<1x2x32xf32>,
    %499 = arith.index_cast %432 : i32 to index
    %c0_125 = arith.constant 0 : index
    %c32_126 = arith.constant 32 : index
    %500 = vector.load %arg9[%499, %c0_125, %c32_126] : memref<8x2x64xf32, #tpu.memory_space<vmem>>, vector<1x2x32xf32>
    %501 = vector.shape_cast %500 : vector<1x2x32xf32> to vector<2x32xf32>
    %502 = vector.shape_cast %494 : vector<2x32xf32> to vector<1x2x32xf32>
    tpu.vector_store %arg9[%499, %c0_125, %c32_126], %502 {strides = array<i32>} : memref<8x2x64xf32, #tpu.memory_space<vmem>>, vector<1x2x32xf32>,
    %c7_i32_127 = arith.constant 7 : i32
    %c7_i32_128 = arith.constant 7 : i32
    %503 = arith.subi %c7_i32_128, %c7_i32_127 : i32
    %504 = arith.index_cast %c7_i32_127 : i32 to index
    %c0_129 = arith.constant 0 : index
    %c0_130 = arith.constant 0 : index
    %505 = vector.load %arg1[%504, %c0_129, %c0_130] : memref<8x2x128xf32, #tpu.memory_space<vmem>>, vector<1x2x128xf32>
    %506 = vector.shape_cast %505 : vector<1x2x128xf32> to vector<2x128xf32>
    %507 = arith.truncf %469 : vector<2x32xf32> to vector<2x32xbf16>
    %cst_131 = arith.constant dense<0.000000e+00> : vector<2x128xf32>
    %508 = tpu.matmul %507, %0, %cst_131 {dimension_numbers = #tpu.dot_dimension_numbers<[1], [0], [0], [1], [0, 0, 1, 1], [], []>} : vector<2x32xbf16>, vector<32x128xbf16>, vector<2x128xf32> -> vector<2x128xf32>
    %509 = arith.addf %506, %508 : vector<2x128xf32>
    %510 = arith.index_cast %503 : i32 to index
    %c0_132 = arith.constant 0 : index
    %c0_133 = arith.constant 0 : index
    %511 = vector.load %arg2[%510, %c0_132, %c0_133] : memref<8x2x128xf32, #tpu.memory_space<vmem>>, vector<1x2x128xf32>
    %512 = vector.shape_cast %511 : vector<1x2x128xf32> to vector<2x128xf32>
    %513 = arith.truncf %494 : vector<2x32xf32> to vector<2x32xbf16>
    %cst_134 = arith.constant dense<0.000000e+00> : vector<2x128xf32>
    %514 = tpu.matmul %513, %1, %cst_134 {dimension_numbers = #tpu.dot_dimension_numbers<[1], [0], [0], [1], [0, 0, 1, 1], [], []>} : vector<2x32xbf16>, vector<32x128xbf16>, vector<2x128xf32> -> vector<2x128xf32>
    %515 = arith.addf %512, %514 : vector<2x128xf32>
    %516 = vector.extract_strided_slice %509 {offsets = [0, 0], sizes = [2, 32], strides = [1, 1]} : vector<2x128xf32> to vector<2x32xf32>
    %517 = arith.negf %516 : vector<2x32xf32>
    %518 = math.exp %517 : vector<2x32xf32>
    %cst_135 = arith.constant 1.000000e+00 : f32
    %519 = vector.broadcast %cst_135 : f32 to vector<2x32xf32>
    %520 = arith.addf %519, %518 : vector<2x32xf32>
    %521 = arith.divf %519, %520 : vector<2x32xf32>
    %522 = vector.extract_strided_slice %509 {offsets = [0, 32], sizes = [2, 32], strides = [1, 1]} : vector<2x128xf32> to vector<2x32xf32>
    %523 = arith.negf %522 : vector<2x32xf32>
    %524 = math.exp %523 : vector<2x32xf32>
    %cst_136 = arith.constant 1.000000e+00 : f32
    %525 = vector.broadcast %cst_136 : f32 to vector<2x32xf32>
    %526 = arith.addf %525, %524 : vector<2x32xf32>
    %527 = arith.divf %525, %526 : vector<2x32xf32>
    %528 = vector.extract_strided_slice %509 {offsets = [0, 64], sizes = [2, 32], strides = [1, 1]} : vector<2x128xf32> to vector<2x32xf32>
    %529 = math.tanh %528 : vector<2x32xf32>
    %530 = vector.extract_strided_slice %509 {offsets = [0, 96], sizes = [2, 32], strides = [1, 1]} : vector<2x128xf32> to vector<2x32xf32>
    %531 = arith.negf %530 : vector<2x32xf32>
    %532 = math.exp %531 : vector<2x32xf32>
    %cst_137 = arith.constant 1.000000e+00 : f32
    %533 = vector.broadcast %cst_137 : f32 to vector<2x32xf32>
    %534 = arith.addf %533, %532 : vector<2x32xf32>
    %535 = arith.divf %533, %534 : vector<2x32xf32>
    %536 = arith.mulf %527, %467 : vector<2x32xf32>
    %537 = arith.mulf %521, %529 : vector<2x32xf32>
    %538 = arith.addf %536, %537 : vector<2x32xf32>
    %539 = math.tanh %538 : vector<2x32xf32>
    %540 = arith.mulf %535, %539 : vector<2x32xf32>
    %541 = vector.extract_strided_slice %515 {offsets = [0, 0], sizes = [2, 32], strides = [1, 1]} : vector<2x128xf32> to vector<2x32xf32>
    %542 = arith.negf %541 : vector<2x32xf32>
    %543 = math.exp %542 : vector<2x32xf32>
    %cst_138 = arith.constant 1.000000e+00 : f32
    %544 = vector.broadcast %cst_138 : f32 to vector<2x32xf32>
    %545 = arith.addf %544, %543 : vector<2x32xf32>
    %546 = arith.divf %544, %545 : vector<2x32xf32>
    %547 = vector.extract_strided_slice %515 {offsets = [0, 32], sizes = [2, 32], strides = [1, 1]} : vector<2x128xf32> to vector<2x32xf32>
    %548 = arith.negf %547 : vector<2x32xf32>
    %549 = math.exp %548 : vector<2x32xf32>
    %cst_139 = arith.constant 1.000000e+00 : f32
    %550 = vector.broadcast %cst_139 : f32 to vector<2x32xf32>
    %551 = arith.addf %550, %549 : vector<2x32xf32>
    %552 = arith.divf %550, %551 : vector<2x32xf32>
    %553 = vector.extract_strided_slice %515 {offsets = [0, 64], sizes = [2, 32], strides = [1, 1]} : vector<2x128xf32> to vector<2x32xf32>
    %554 = math.tanh %553 : vector<2x32xf32>
    %555 = vector.extract_strided_slice %515 {offsets = [0, 96], sizes = [2, 32], strides = [1, 1]} : vector<2x128xf32> to vector<2x32xf32>
    %556 = arith.negf %555 : vector<2x32xf32>
    %557 = math.exp %556 : vector<2x32xf32>
    %cst_140 = arith.constant 1.000000e+00 : f32
    %558 = vector.broadcast %cst_140 : f32 to vector<2x32xf32>
    %559 = arith.addf %558, %557 : vector<2x32xf32>
    %560 = arith.divf %558, %559 : vector<2x32xf32>
    %561 = arith.mulf %552, %492 : vector<2x32xf32>
    %562 = arith.mulf %546, %554 : vector<2x32xf32>
    %563 = arith.addf %561, %562 : vector<2x32xf32>
    %564 = math.tanh %563 : vector<2x32xf32>
    %565 = arith.mulf %560, %564 : vector<2x32xf32>
    %566 = arith.index_cast %c7_i32_127 : i32 to index
    %c0_141 = arith.constant 0 : index
    %c0_142 = arith.constant 0 : index
    %567 = vector.load %arg9[%566, %c0_141, %c0_142] : memref<8x2x64xf32, #tpu.memory_space<vmem>>, vector<1x2x32xf32>
    %568 = vector.shape_cast %567 : vector<1x2x32xf32> to vector<2x32xf32>
    %569 = vector.shape_cast %540 : vector<2x32xf32> to vector<1x2x32xf32>
    tpu.vector_store %arg9[%566, %c0_141, %c0_142], %569 {strides = array<i32>} : memref<8x2x64xf32, #tpu.memory_space<vmem>>, vector<1x2x32xf32>,
    %570 = arith.index_cast %503 : i32 to index
    %c0_143 = arith.constant 0 : index
    %c32_144 = arith.constant 32 : index
    %571 = vector.load %arg9[%570, %c0_143, %c32_144] : memref<8x2x64xf32, #tpu.memory_space<vmem>>, vector<1x2x32xf32>
    %572 = vector.shape_cast %571 : vector<1x2x32xf32> to vector<2x32xf32>
    %573 = vector.shape_cast %565 : vector<2x32xf32> to vector<1x2x32xf32>
    tpu.vector_store %arg9[%570, %c0_143, %c32_144], %573 {strides = array<i32>} : memref<8x2x64xf32, #tpu.memory_space<vmem>>, vector<1x2x32xf32>,
    %c8_i32 = arith.constant 8 : i32
    %c0_145 = arith.constant 0 : index
    %c0_146 = arith.constant 0 : index
    %574 = vector.load %arg10[%c0_145, %c0_146] : memref<2x32xf32, #tpu.memory_space<vmem>>, vector<2x32xf32>
    tpu.vector_store %arg10[%c0_145, %c0_146], %540 {strides = array<i32>} : memref<2x32xf32, #tpu.memory_space<vmem>>, vector<2x32xf32>,
    %c0_147 = arith.constant 0 : index
    %c0_148 = arith.constant 0 : index
    %575 = vector.load %arg11[%c0_147, %c0_148] : memref<2x32xf32, #tpu.memory_space<vmem>>, vector<2x32xf32>
    tpu.vector_store %arg11[%c0_147, %c0_148], %538 {strides = array<i32>} : memref<2x32xf32, #tpu.memory_space<vmem>>, vector<2x32xf32>,
    %c0_149 = arith.constant 0 : index
    %c0_150 = arith.constant 0 : index
    %576 = vector.load %arg12[%c0_149, %c0_150] : memref<2x32xf32, #tpu.memory_space<vmem>>, vector<2x32xf32>
    tpu.vector_store %arg12[%c0_149, %c0_150], %565 {strides = array<i32>} : memref<2x32xf32, #tpu.memory_space<vmem>>, vector<2x32xf32>,
    %c0_151 = arith.constant 0 : index
    %c0_152 = arith.constant 0 : index
    %577 = vector.load %arg13[%c0_151, %c0_152] : memref<2x32xf32, #tpu.memory_space<vmem>>, vector<2x32xf32>
    tpu.vector_store %arg13[%c0_151, %c0_152], %563 {strides = array<i32>} : memref<2x32xf32, #tpu.memory_space<vmem>>, vector<2x32xf32>,
    return
  }
  func.func @transform_0(%arg0: i32) -> (i32, i32, i32) {
    %c0_i32 = arith.constant 0 : i32
    %c0_i32_0 = arith.constant 0 : i32
    %c0_i32_1 = arith.constant 0 : i32
    %c0_i32_2 = arith.constant 0 : i32
    return %c0_i32, %c0_i32_0, %c0_i32_1 : i32, i32, i32
  }
  func.func @transform_1(%arg0: i32) -> (i32, i32, i32) {
    %c0_i32 = arith.constant 0 : i32
    %c0_i32_0 = arith.constant 0 : i32
    %c0_i32_1 = arith.constant 0 : i32
    %c0_i32_2 = arith.constant 0 : i32
    return %c0_i32, %c0_i32_0, %c0_i32_1 : i32, i32, i32
  }
  func.func @transform_2(%arg0: i32) -> (i32, i32) {
    %c0_i32 = arith.constant 0 : i32
    %c0_i32_0 = arith.constant 0 : i32
    %c0_i32_1 = arith.constant 0 : i32
    return %c0_i32, %c0_i32_0 : i32, i32
  }
  func.func @transform_3(%arg0: i32) -> (i32, i32) {
    %c0_i32 = arith.constant 0 : i32
    %c0_i32_0 = arith.constant 0 : i32
    %c0_i32_1 = arith.constant 0 : i32
    return %c0_i32, %c0_i32_0 : i32, i32
  }
  func.func @transform_4(%arg0: i32) -> (i32, i32) {
    %c0_i32 = arith.constant 0 : i32
    %c0_i32_0 = arith.constant 0 : i32
    %c0_i32_1 = arith.constant 0 : i32
    return %c0_i32, %c0_i32_0 : i32, i32
  }
  func.func @transform_5(%arg0: i32) -> (i32, i32) {
    %c0_i32 = arith.constant 0 : i32
    %c0_i32_0 = arith.constant 0 : i32
    %c0_i32_1 = arith.constant 0 : i32
    return %c0_i32, %c0_i32_0 : i32, i32
  }
  func.func @transform_6(%arg0: i32) -> (i32, i32) {
    %c0_i32 = arith.constant 0 : i32
    %c0_i32_0 = arith.constant 0 : i32
    %c0_i32_1 = arith.constant 0 : i32
    return %c0_i32, %c0_i32_0 : i32, i32
  }
  func.func @transform_7(%arg0: i32) -> (i32, i32) {
    %c0_i32 = arith.constant 0 : i32
    %c0_i32_0 = arith.constant 0 : i32
    %c0_i32_1 = arith.constant 0 : i32
    return %c0_i32, %c0_i32_0 : i32, i32
  }
  func.func @transform_8(%arg0: i32) -> (i32, i32, i32) {
    %c0_i32 = arith.constant 0 : i32
    %c0_i32_0 = arith.constant 0 : i32
    %c0_i32_1 = arith.constant 0 : i32
    %c0_i32_2 = arith.constant 0 : i32
    return %c0_i32, %c0_i32_0, %c0_i32_1 : i32, i32, i32
  }
  func.func @transform_9(%arg0: i32) -> (i32, i32) {
    %c0_i32 = arith.constant 0 : i32
    %c0_i32_0 = arith.constant 0 : i32
    %c0_i32_1 = arith.constant 0 : i32
    return %c0_i32, %c0_i32_0 : i32, i32
  }
  func.func @transform_10(%arg0: i32) -> (i32, i32) {
    %c0_i32 = arith.constant 0 : i32
    %c0_i32_0 = arith.constant 0 : i32
    %c0_i32_1 = arith.constant 0 : i32
    return %c0_i32, %c0_i32_0 : i32, i32
  }
  func.func @transform_11(%arg0: i32) -> (i32, i32) {
    %c0_i32 = arith.constant 0 : i32
    %c0_i32_0 = arith.constant 0 : i32
    %c0_i32_1 = arith.constant 0 : i32
    return %c0_i32, %c0_i32_0 : i32, i32
  }
  func.func @transform_12(%arg0: i32) -> (i32, i32) {
    %c0_i32 = arith.constant 0 : i32
    %c0_i32_0 = arith.constant 0 : i32
    %c0_i32_1 = arith.constant 0 : i32
    return %c0_i32, %c0_i32_0 : i32, i32
  }
}

</mosaic_0001>

<bundles_post_ra>
// kernel: tpu_custom_call.1
= control target key start
LH: loop header
LB: loop body
LE: loop exit
PB: predicated region body
PF: predicated region fallthrough
CT: control target
= control target key end

     0   :  { %18 = vsyncpa [#allocation3], 0  ;;  %s2522_s0 = inlined_call_operand.hbm [shape: f32[8,2,128], index: 0, kind: input, shape index: {}]   ;;  %s2523_s1 = inlined_call_operand.hbm [shape: f32[8,2,128], index: 1, kind: input, shape index: {}]   ;;  %s2524_s2 = inlined_call_operand.vmem [shape: f32[2,32], index: 2, kind: input, shape index: {}]   ;;  %s2525_s3 = inlined_call_operand.vmem [shape: f32[2,32], index: 3, kind: input, shape index: {}]   ;;  %s2526_s4 = inlined_call_operand.vmem [shape: f32[2,32], index: 4, kind: input, shape index: {}]   ;;  %s2527_s5 = inlined_call_operand.vmem [shape: f32[2,32], index: 5, kind: input, shape index: {}]   ;;  %s2528_s6 = inlined_call_operand.hbm [shape: bf16[32,128], index: 6, kind: input, shape index: {}]   ;;  %s2529_s7 = inlined_call_operand.hbm [shape: bf16[32,128], index: 7, kind: input, shape index: {}]   ;;  %s2530_s8 = inlined_call_operand.hbm [shape: f32[8,2,64], index: 8, kind: output, shape index: {0}]   ;;  %s2531_s9 = inlined_call_operand.hbm [shape: f32[2,32], index: 9, kind: output, shape index: {1}]   ;;  %s2532_s10 = inlined_call_operand.hbm [shape: f32[2,32], index: 10, kind: output, shape index: {2}]   ;;  %s2533_s11 = inlined_call_operand.hbm [shape: f32[2,32], index: 11, kind: output, shape index: {3}]   ;;  %s2534_s12 = inlined_call_operand.hbm [shape: f32[2,32], index: 12, kind: output, shape index: {4}]  }
   0x1   :  { %19 = vsyncpa [#allocation6], 0 }
   0x2   :  { %20 = vsyncpa [#allocation9], 0 }
   0x3   :  { %21 = vsyncpa [#allocation4], 0 }
   0x4   :  { %22 = vsyncpa [#allocation12], 0 }
   0x5   :  { %23 = vsyncpa [#allocation15], 0  ;;  %s2043_s21 = smov [#allocation5]   ;;  %s2044_s23 = smov [#allocation2]  }
   0x6   :  { %s41_s22 = sshll.u32 %s2043_s21, 4  ;;  %s29_s24 = sshll.u32 %s2044_s23, 4  ;;  %s42_s22 = int_to_ptr.vmem [resolvable:$true] %s41_s22  ;;  %s30_s24 = int_to_ptr.vmem [resolvable:$true] %s29_s24 }
   0x7   :  { %s1859_s25 = scalar_lea.vmem %s42_s22, 256  ;;  %p1864_p1 = scmp.lt.s32.totalorder %s42_s22, %s42_s22 }
   0x8   :  { %p1860_p0 = scmp.ne.s32.totalorder %s42_s22, %s1859_s25  ;;  %p1865_p2 = scmp.lt.s32.totalorder %s1859_s25, %s1859_s25 }
   0xa   :  { %p1866_p3 = por %p1865_p2, %p1864_p1 }
   0xc   :  { %p1867_p4 = pnand %p1866_p3, %p1860_p0 }
   0xe   :  { %1870 = shalt.err (!%p1867_p4)
}
   0xf   :  { %s2045_s26 = smov 32   ;;  %s2046_s27 = smov 2  }
  0x10   :  { %47 = dma.hbm_to_vmem [thread:$0]  %s2523_s1, 256, %s42_s22, [#allocation6], %s2045_s26, %s2045_s26, %s2046_s27  }
  0x11   :  { %s1879_s30 = scalar_lea.vmem %s30_s24, 256  ;;  %p1884_p6 = scmp.lt.s32.totalorder %s30_s24, %s30_s24 }
  0x12   :  { %p1880_p5 = scmp.ne.s32.totalorder %s30_s24, %s1879_s30  ;;  %p1885_p7 = scmp.lt.s32.totalorder %s1879_s30, %s1879_s30 }
  0x14   :  { %p1886_p8 = por %p1885_p7, %p1884_p6 }
  0x16   :  { %p1887_p9 = pnand %p1886_p8, %p1880_p5 }
  0x18   :  { %1890 = shalt.err (!%p1887_p9)
}
  0x19   :  { %35 = dma.hbm_to_vmem [thread:$0]  %s2522_s0, 256, %s30_s24, [#allocation3], %s2045_s26, %s2045_s26, %s2046_s27  }
  0x1a   :  { %s2047_s15 = smov [#allocation7]  }
  0x1b   :  { %s61_s16 = sshll.u32 %s2047_s15, 4  ;;  %s62_s16 = int_to_ptr.vmem [resolvable:$true] %s61_s16 }
  0x1c   :  { %s1899_s17 = scalar_lea.vmem %s62_s16, 256  ;;  %p1904_p11 = scmp.lt.s32.totalorder %s62_s16, %s62_s16 }
  0x1d   :  { %p1900_p10 = scmp.ne.s32.totalorder %s62_s16, %s1899_s17  ;;  %p1905_p12 = scmp.lt.s32.totalorder %s1899_s17, %s1899_s17 }
  0x1f   :  { %p1906_p13 = por %p1905_p12, %p1904_p11 }
  0x21   :  { %p1907_p0 = pnand %p1906_p13, %p1900_p10 }
  0x23   :  { %1910 = shalt.err (!%p1907_p0)
}
  0x24   :  { %s2048_s1 = smov 64   ;;  %s2049_s18 = smov 4  }
  0x25   :  { %67 = dma.hbm_to_vmem [thread:$0]  %s2528_s6, 256, %s62_s16, [#allocation6], %s2048_s1, %s2048_s1, %s2049_s18  }
  0x26   :  { %s2050_s21 = smov [#allocation8]  }
  0x27   :  { %s73_s0 = sshll.u32 %s2050_s21, 4  ;;  %s74_s0 = int_to_ptr.vmem [resolvable:$true] %s73_s0 }
  0x28   :  { %s1919_s22 = scalar_lea.vmem %s74_s0, 256  ;;  %p1924_p2 = scmp.lt.s32.totalorder %s74_s0, %s74_s0 }
  0x29   :  { %p1920_p1 = scmp.ne.s32.totalorder %s74_s0, %s1919_s22  ;;  %p1925_p3 = scmp.lt.s32.totalorder %s1919_s22, %s1919_s22 }
  0x2b   :  { %p1926_p4 = por %p1925_p3, %p1924_p2 }
  0x2d   :  { %p1927_p5 = pnand %p1926_p4, %p1920_p1 }
  0x2f   :  { %1930 = shalt.err (!%p1927_p5)
}
  0x30   :  { %79 = dma.hbm_to_vmem [thread:$0]  %s2529_s7, 256, %s74_s0, [#allocation9], %s2048_s1, %s2048_s1, %s2049_s18  }
  0x31   :  { %2031 = dma.done.wait [#allocation3], 256  }
  0x32   :  { %2032 = vsyncadd [#allocation3], 4294967040 }
  0x33   :  { %2033 = dma.done.wait [#allocation6], 512  }
  0x34   :  { %2034 = vsyncadd [#allocation6], 4294966784 }
  0x35   :  { %2035 = dma.done.wait [#allocation9], 256  }
  0x36   :  { %2036 = vsyncadd [#allocation9], 4294967040  ;;  %v2051_v0 = vmov 0.0   ;;  %vm2052_vm0 = vmmov 0   ;;  %v2152_v1 = vld [vmem:[#allocation7 + $0x8] sm:$0xff]   ;;  %v2154_v2 = vld [vmem:[#allocation8 + $0x8] sm:$0xff]  }
  0x37   :  { %1575 = vmatprep.subr.bf16.mxu0 %v2051_v0  ;;  %1583 = vmatprep.subr.bf16.mxu1 %v2051_v0  ;;  %v2157_v3 = vld [vmem:[#allocation7] sm:$0xff]   ;;  %v2161_v4 = vld [vmem:[#allocation8] sm:$0xff]   ;;  %vm119_vm1 = vcmask 261120   ;;  %v165_v12 = vld [vmem:[#allocation5 + $0xe] sm:$0x3]  ;;  %vm283_vm2 = vcmask 254976  }
  0x38   :  { %1579 = vmatprep.mubr.msk.bf16.mxu0 %vm2052_vm0, %v2051_v0  ;;  %1587 = vmatprep.mubr.msk.bf16.mxu1 %vm2052_vm0, %v2051_v0  ;;  %v101_v5 = vld [vmem:[%s2524_s2] sm:$0x3]  ;;  %v293_v55 = vld [vmem:[#allocation2 + $0x2] sm:$0x3]  ;;  %v343_v59 = vld [vmem:[#allocation5 + $0xc] sm:$0x3] }
  0x39   :  { %1576 = vmatpush3.bf16.msra.mxu0 %v2152_v1  ;;  %1584 = vmatpush3.bf16.msra.mxu1 %v2154_v2  ;;  %v103_v6 = vld [vmem:[%s2526_s4] sm:$0x3]  ;;  %v106_v8 = vpack.c.bf16 %v101_v5, %v101_v5  ;;  %vm290_vm3 = vcmask 517376   ;;  %s2053_s2 = smov 96   ;;  %s2056_s16 = smov [#allocation10]  }
  0x3a   :  { %1577 = vmatprep.subr.bf16.mxu0 %v2051_v0  ;;  %1585 = vmatprep.subr.bf16.mxu1 %v2051_v0  ;;  %v102_v7 = vld [vmem:[%s2525_s3] sm:$0x3]  ;;  %v166_v9 = vpack.c.bf16 %v103_v6, %v103_v6  ;;  %s2054_s3 = smov [#allocation11]   ;;  %s1423_s17 = sshll.u32 %s2056_s16, 4  ;;  %s1424_s17 = int_to_ptr.vmem [resolvable:$true] %s1423_s17 }
  0x3b   :  { %231 = vrot.lane.b32.xlu1 %v102_v7, %s2045_s26  ;;  %v104_v10 = vld [vmem:[%s2527_s5] sm:$0x3]  ;;  %s1436_s4 = sshll.u32 %s2054_s3, 4  ;;  %s2055_s5 = smov [#allocation14]   ;;  %s1437_s4 = int_to_ptr.vmem [resolvable:$true] %s1436_s4 }
  0x3c   :  { %v105_v11 = vld [vmem:[#allocation2] sm:$0x3]  ;;  %s1456_s15 = sshll.u32 %s2055_s5, 4  ;;  %s1931_s19 = scalar_lea.vmem %s1437_s4, 32  ;;  %s1457_s15 = int_to_ptr.vmem [resolvable:$true] %s1456_s15 }
  0x3d   :  { %1578 = vmatpush3.bf16.msra.mxu0 %v2157_v3  ;;  %1586 = vmatpush3.bf16.msra.mxu1 %v2161_v4  ;;  %p1932_p6 = scmp.ne.s32.totalorder %s1437_s4, %s1931_s19  ;;  %p1936_p7 = scmp.lt.s32.totalorder %s1437_s4, %s1437_s4 }
  0x3e   :  { %1591 = vmatprep.subr.bf16.mxu0 %v2051_v0  ;;  %1599 = vmatprep.subr.bf16.mxu1 %v2051_v0  ;;  %p1937_p8 = scmp.lt.s32.totalorder %s1931_s19, %s1931_s19 }
  0x3f   :  { %259 = vrot.lane.b32.xlu1 %v104_v10, %s2045_s26 }
  0x40   :  { %1580 = vmatmul.mubr.msk.bf16.vlgmr.msra.gmra.mxu0 %vm119_vm1, %v106_v8  ;;  %1588 = vmatmul.mubr.msk.bf16.vlgmr.msra.gmra.mxu1 %vm119_vm1, %v166_v9  ;;  %p1938_p9 = por %p1937_p8, %p1936_p7 }
  0x41   :  { %1592 = vmatpush3.bf16.msra.mxu0 %v2152_v1  ;;  %1600 = vmatpush3.bf16.msra.mxu1 %v2154_v2 }
  0x42   :  { %1593 = vmatprep.subr.bf16.mxu0 %v2051_v0  ;;  %1595 = vmatprep.mubr.msk.bf16.mxu0 %vm2052_vm0, %v2051_v0  ;;  %p1939_p10 = pnand %p1938_p9, %p1932_p6 }
  0x43   :  { %1601 = vmatprep.subr.bf16.mxu1 %v2051_v0  ;;  %1603 = vmatprep.mubr.msk.bf16.mxu1 %vm2052_vm0, %v2051_v0 }
  0x45   :  { %1594 = vmatpush3.bf16.msra.mxu0 %v2157_v3  ;;  %1602 = vmatpush3.bf16.msra.mxu1 %v2161_v4 }
  0x46   :  { %1607 = vmatprep.subr.bf16.mxu0 %v2051_v0  ;;  %1615 = vmatprep.subr.bf16.mxu1 %v2051_v0 }
  0xad   :  { %v232_v37 = vpop.permute.xlu1 %231 }
  0xb1   :  { %v260_v39 = vpop.permute.xlu1 %259 }
 0x100   :  { %v157_v13 = vpop.f32.mrf.mxu0  ;;  %v216_v15 = vpop.f32.mrf.mxu1 }
 0x101   :  { %v163_v14 = vadd.f32 %v157_v13, %v105_v11  ;;  %v222_v16 = vadd.f32 %v216_v15, %v165_v12 }
 0x102   :  { %v1581_v17 = vpop.f32.mrf.mxu0  ;;  %v1589_v18 = vpop.f32.mrf.mxu1 }
 0x103   :  { %1723 = vtanh.f32 %v163_v14  ;;  %v1497_v25 = vmul.f32 -1.442695, %v163_v14  ;;  %v1498_v26 = vmul.f32 -1.442695, %v222_v16 }
 0x104   :  { %v160_v19 = vpop.f32.mrf.mxu0  ;;  %1725 = vtanh.f32 %v222_v16  ;;  %v219_v20 = vpop.f32.mrf.mxu1 }
 0x105   :  { %1727 = vpow2.f32 %v1497_v25 }
 0x106   :  { %v1582_v21 = vpop.f32.mrf.mxu0  ;;  %v1590_v22 = vpop.f32.mrf.mxu1  ;;  %1729 = vpow2.f32 %v1498_v26 }
 0x110   :  { %v1724_v23 = vpop.eup %1723 }
 0x111   :  { %236 = vrot.lane.b32.xlu0 %v1724_v23, %s2048_s1  ;;  %v1726_v24 = vpop.eup %1725 }
 0x112   :  { %v1728_v27 = vpop.eup %1727 }
 0x113   :  { %v226_v28 = vadd.f32 1.0, %v1728_v27  ;;  %v1730_v29 = vpop.eup %1729 }
 0x114   :  { %v254_v30 = vadd.f32 1.0, %v1730_v29 }
 0x115   :  { %264 = vrot.lane.b32.xlu0 %v1726_v24, %s2048_s1  ;;  %1731 = vrcp.f32 %v226_v28 }
 0x116   :  { %1733 = vrcp.f32 %v254_v30 }
 0x122   :  { %v1732_v31 = vpop.eup %1731 }
 0x123   :  { %v1734_v34 = vpop.eup %1733  ;;  %v234_v38 = vmul.f32 %v1732_v31, %v232_v37 }
 0x124   :  { %v262_v42 = vmul.f32 %v1734_v34, %v260_v39 }
 0x183   :  { %v237_v32 = vpop.permute.xlu0 %236 }
 0x184   :  { %v239_v33 = vmul.f32 %v1732_v31, %v237_v32 }
 0x186   :  { %241 = vrot.lane.b32.xlu0 %v239_v33, %s2045_s26 }
 0x187   :  { %v265_v35 = vpop.permute.xlu0 %264 }
 0x188   :  { %v267_v36 = vmul.f32 %v1734_v34, %v265_v35 }
 0x18a   :  { %269 = vrot.lane.b32.xlu1 %v267_v36, %s2045_s26 }
 0x1f8   :  { %v242_v40 = vpop.permute.xlu0 %241 }
 0x1f9   :  { %v2200_v41 = vadd.f32 %v242_v40, %v234_v38  ;;  %v453_v38 = vld [vmem:[#allocation2 + $0x4] sm:$0x3] }
 0x1fb   :  { %1735 = vtanh.f32 %v2200_v41 }
 0x1fc   :  { %v270_v43 = vpop.permute.xlu1 %269 }
 0x1fd   :  { %v2203_v44 = vadd.f32 %v270_v43, %v262_v42  ;;  %v503_v42 = vld [vmem:[#allocation5 + $0xa] sm:$0x3] }
 0x1ff   :  { %1737 = vtanh.f32 %v2203_v44 }
 0x208   :  { %v1736_v45 = vpop.eup %1735 }
 0x209   :  { %247 = vrot.lane.b32.xlu0 %v1736_v45, %s2048_s1 }
 0x20c   :  { %v1738_v46 = vpop.eup %1737 }
 0x20d   :  { %275 = vrot.lane.b32.xlu1 %v1738_v46, %s2048_s1 }
 0x27b   :  { %v248_v47 = vpop.permute.xlu0 %247 }
 0x27c   :  { %v2208_v48 = vmul.f32 %v1732_v31, %v248_v47 }
 0x27e   :  { %v294_v49 = vpack.c.bf16 %v2208_v48, %v2208_v48 }
 0x27f   :  { %v276_v50 = vpop.permute.xlu1 %275 }
 0x280   :  { %v2212_v51 = vmul.f32 %v1734_v34, %v276_v50  ;;  %296 = vrot.lane.b32.xlu0 %v294_v49, %s2045_s26 }
 0x282   :  { %v344_v52 = vpack.c.bf16 %v2212_v51, %v2212_v51 }
 0x284   :  { %346 = vrot.lane.b32.xlu1 %v344_v52, %s2045_s26 }
 0x2f2   :  { %v297_v53 = vpop.permute.xlu0 %296 }
 0x2f3   :  { %1596 = vmatmul.mubr.msk.bf16.vlgmr.msra.gmra.mxu0 %vm119_vm1, %v297_v53 }
 0x2f4   :  { %1608 = vmatpush3.bf16.msra.mxu0 %v2152_v1  ;;  %1611 = vmatprep.mubr.msk.bf16.mxu0 %vm2052_vm0, %v2051_v0 }
 0x2f5   :  { %1609 = vmatprep.subr.bf16.mxu0 %v2051_v0 }
 0x2f6   :  { %v347_v54 = vpop.permute.xlu1 %346 }
 0x2f7   :  { %1604 = vmatmul.mubr.msk.bf16.vlgmr.msra.gmra.mxu1 %vm119_vm1, %v347_v54 }
 0x2f8   :  { %1610 = vmatpush3.bf16.msra.mxu0 %v2157_v3  ;;  %1616 = vmatpush3.bf16.msra.mxu1 %v2154_v2 }
 0x2f9   :  { %1617 = vmatprep.subr.bf16.mxu1 %v2051_v0  ;;  %1619 = vmatprep.mubr.msk.bf16.mxu1 %vm2052_vm0, %v2051_v0 }
 0x2fa   :  { %1623 = vmatprep.subr.bf16.mxu0 %v2051_v0 }
 0x2fc   :  { %1618 = vmatpush3.bf16.msra.mxu1 %v2161_v4 }
 0x2fd   :  { %1631 = vmatprep.subr.bf16.mxu1 %v2051_v0 }
 0x3b3   :  { %v335_v56 = vpop.f32.mrf.mxu0 }
 0x3b4   :  { %v341_v57 = vadd.f32 %v335_v56, %v293_v55 }
 0x3b5   :  { %v1597_v58 = vpop.f32.mrf.mxu0 }
 0x3b6   :  { %1739 = vtanh.f32 %v341_v57  ;;  %v1501_v10 = vmul.f32 -1.442695, %v341_v57 }
 0x3b7   :  { %v338_v60 = vpop.f32.mrf.mxu0  ;;  %v385_v61 = vpop.f32.mrf.mxu1 }
 0x3b8   :  { %v391_v62 = vadd.f32 %v385_v61, %v343_v59 }
 0x3b9   :  { %v1598_v63 = vpop.f32.mrf.mxu0  ;;  %v1605_v5 = vpop.f32.mrf.mxu1 }
 0x3ba   :  { %1741 = vtanh.f32 %v391_v62  ;;  %v1502_v11 = vmul.f32 -1.442695, %v391_v62 }
 0x3bb   :  { %v388_v6 = vpop.f32.mrf.mxu1  ;;  %1743 = vpow2.f32 %v1501_v10 }
 0x3bc   :  { %1745 = vpow2.f32 %v1502_v11 }
 0x3bd   :  { %v1606_v7 = vpop.f32.mrf.mxu1 }
 0x3c3   :  { %v1740_v8 = vpop.eup %1739 }
 0x3c4   :  { %401 = vrot.lane.b32.xlu0 %v1740_v8, %s2048_s1 }
 0x3c7   :  { %v1742_v9 = vpop.eup %1741 }
 0x3c8   :  { %425 = vrot.lane.b32.xlu1 %v1742_v9, %s2048_s1  ;;  %v1744_v12 = vpop.eup %1743 }
 0x3c9   :  { %v395_v13 = vadd.f32 1.0, %v1744_v12  ;;  %v1746_v14 = vpop.eup %1745 }
 0x3ca   :  { %v419_v15 = vadd.f32 1.0, %v1746_v14 }
 0x3cb   :  { %1747 = vrcp.f32 %v395_v13 }
 0x3cc   :  { %1749 = vrcp.f32 %v419_v15 }
 0x3d8   :  { %v1748_v16 = vpop.eup %1747 }
 0x3d9   :  { %v1750_v19 = vpop.eup %1749  ;;  %v399_v22 = vmul.f32 %v1748_v16, %v2200_v41 }
 0x3da   :  { %v423_v25 = vmul.f32 %v1750_v19, %v2203_v44 }
 0x436   :  { %v402_v17 = vpop.permute.xlu0 %401 }
 0x437   :  { %v404_v18 = vmul.f32 %v1748_v16, %v402_v17 }
 0x439   :  { %406 = vrot.lane.b32.xlu0 %v404_v18, %s2045_s26 }
 0x43a   :  { %v426_v20 = vpop.permute.xlu1 %425 }
 0x43b   :  { %v428_v21 = vmul.f32 %v1750_v19, %v426_v20 }
 0x43d   :  { %430 = vrot.lane.b32.xlu1 %v428_v21, %s2045_s26 }
 0x4ab   :  { %v407_v23 = vpop.permute.xlu0 %406 }
 0x4ac   :  { %v2237_v24 = vadd.f32 %v407_v23, %v399_v22  ;;  %v613_v23 = vld [vmem:[#allocation2 + $0x6] sm:$0x3] }
 0x4ae   :  { %1751 = vtanh.f32 %v2237_v24 }
 0x4af   :  { %v431_v26 = vpop.permute.xlu1 %430 }
 0x4b0   :  { %v2241_v27 = vadd.f32 %v431_v26, %v423_v25 }
 0x4b2   :  { %1753 = vtanh.f32 %v2241_v27 }
 0x4bb   :  { %v1752_v28 = vpop.eup %1751 }
 0x4bc   :  { %412 = vrot.lane.b32.xlu0 %v1752_v28, %s2048_s1 }
 0x4bf   :  { %v1754_v29 = vpop.eup %1753 }
 0x4c0   :  { %436 = vrot.lane.b32.xlu1 %v1754_v29, %s2048_s1 }
 0x52e   :  { %v413_v30 = vpop.permute.xlu0 %412 }
 0x52f   :  { %v2246_v31 = vmul.f32 %v1748_v16, %v413_v30 }
 0x531   :  { %v454_v32 = vpack.c.bf16 %v2246_v31, %v2246_v31 }
 0x532   :  { %v437_v33 = vpop.permute.xlu1 %436 }
 0x533   :  { %v2250_v34 = vmul.f32 %v1750_v19, %v437_v33  ;;  %456 = vrot.lane.b32.xlu0 %v454_v32, %s2045_s26 }
 0x535   :  { %v504_v35 = vpack.c.bf16 %v2250_v34, %v2250_v34 }
 0x537   :  { %506 = vrot.lane.b32.xlu1 %v504_v35, %s2045_s26 }
 0x5a5   :  { %v457_v36 = vpop.permute.xlu0 %456 }
 0x5a6   :  { %1612 = vmatmul.mubr.msk.bf16.vlgmr.msra.gmra.mxu0 %vm119_vm1, %v457_v36 }
 0x5a7   :  { %1624 = vmatpush3.bf16.msra.mxu0 %v2152_v1  ;;  %1627 = vmatprep.mubr.msk.bf16.mxu0 %vm2052_vm0, %v2051_v0 }
 0x5a8   :  { %1625 = vmatprep.subr.bf16.mxu0 %v2051_v0 }
 0x5a9   :  { %v507_v37 = vpop.permute.xlu1 %506 }
 0x5aa   :  { %1620 = vmatmul.mubr.msk.bf16.vlgmr.msra.gmra.mxu1 %vm119_vm1, %v507_v37 }
 0x5ab   :  { %1626 = vmatpush3.bf16.msra.mxu0 %v2157_v3  ;;  %1632 = vmatpush3.bf16.msra.mxu1 %v2154_v2 }
 0x5ac   :  { %1633 = vmatprep.subr.bf16.mxu1 %v2051_v0  ;;  %1635 = vmatprep.mubr.msk.bf16.mxu1 %vm2052_vm0, %v2051_v0 }
 0x5ad   :  { %1639 = vmatprep.subr.bf16.mxu0 %v2051_v0 }
 0x5af   :  { %1634 = vmatpush3.bf16.msra.mxu1 %v2161_v4 }
 0x5b0   :  { %1647 = vmatprep.subr.bf16.mxu1 %v2051_v0 }
 0x666   :  { %v495_v39 = vpop.f32.mrf.mxu0 }
 0x667   :  { %v501_v40 = vadd.f32 %v495_v39, %v453_v38 }
 0x668   :  { %v1613_v41 = vpop.f32.mrf.mxu0 }
 0x669   :  { %1755 = vtanh.f32 %v501_v40  ;;  %v1505_v54 = vmul.f32 -1.442695, %v501_v40 }
 0x66a   :  { %v498_v43 = vpop.f32.mrf.mxu0  ;;  %v545_v44 = vpop.f32.mrf.mxu1 }
 0x66b   :  { %v551_v45 = vadd.f32 %v545_v44, %v503_v42 }
 0x66c   :  { %v1614_v46 = vpop.f32.mrf.mxu0  ;;  %v1621_v47 = vpop.f32.mrf.mxu1 }
 0x66d   :  { %1757 = vtanh.f32 %v551_v45  ;;  %v1506_v55 = vmul.f32 -1.442695, %v551_v45 }
 0x66e   :  { %v548_v49 = vpop.f32.mrf.mxu1  ;;  %1759 = vpow2.f32 %v1505_v54 }
 0x66f   :  { %1761 = vpow2.f32 %v1506_v55 }
 0x670   :  { %v1622_v50 = vpop.f32.mrf.mxu1 }
 0x676   :  { %v1756_v52 = vpop.eup %1755 }
 0x677   :  { %561 = vrot.lane.b32.xlu0 %v1756_v52, %s2048_s1 }
 0x67a   :  { %v1758_v53 = vpop.eup %1757 }
 0x67b   :  { %585 = vrot.lane.b32.xlu1 %v1758_v53, %s2048_s1  ;;  %v1760_v56 = vpop.eup %1759 }
 0x67c   :  { %v555_v57 = vadd.f32 1.0, %v1760_v56  ;;  %v1762_v58 = vpop.eup %1761 }
 0x67d   :  { %v579_v59 = vadd.f32 1.0, %v1762_v58 }
 0x67e   :  { %1763 = vrcp.f32 %v555_v57 }
 0x67f   :  { %1765 = vrcp.f32 %v579_v59 }
 0x68b   :  { %v1764_v60 = vpop.eup %1763 }
 0x68c   :  { %v1766_v63 = vpop.eup %1765  ;;  %v559_v7 = vmul.f32 %v1764_v60, %v2237_v24 }
 0x68d   :  { %v583_v10 = vmul.f32 %v1766_v63, %v2241_v27  ;;  %v663_v27 = vld [vmem:[#allocation5 + $0x8] sm:$0x3] }
 0x6e9   :  { %v562_v61 = vpop.permute.xlu0 %561 }
 0x6ea   :  { %v564_v62 = vmul.f32 %v1764_v60, %v562_v61 }
 0x6ec   :  { %566 = vrot.lane.b32.xlu0 %v564_v62, %s2045_s26 }
 0x6ed   :  { %v586_v5 = vpop.permute.xlu1 %585 }
 0x6ee   :  { %v588_v6 = vmul.f32 %v1766_v63, %v586_v5 }
 0x6f0   :  { %590 = vrot.lane.b32.xlu1 %v588_v6, %s2045_s26 }
 0x75e   :  { %v567_v8 = vpop.permute.xlu0 %566 }
 0x75f   :  { %v2275_v9 = vadd.f32 %v567_v8, %v559_v7 }
 0x761   :  { %1767 = vtanh.f32 %v2275_v9 }
 0x762   :  { %v591_v11 = vpop.permute.xlu1 %590 }
 0x763   :  { %v2279_v12 = vadd.f32 %v591_v11, %v583_v10  ;;  %v773_v10 = vld [vmem:[#allocation2 + $0x8] sm:$0x3] }
 0x765   :  { %1769 = vtanh.f32 %v2279_v12 }
 0x76e   :  { %v1768_v13 = vpop.eup %1767 }
 0x76f   :  { %572 = vrot.lane.b32.xlu0 %v1768_v13, %s2048_s1 }
 0x772   :  { %v1770_v14 = vpop.eup %1769 }
 0x773   :  { %596 = vrot.lane.b32.xlu1 %v1770_v14, %s2048_s1  ;;  %v823_v14 = vld [vmem:[#allocation5 + $0x6] sm:$0x3] }
 0x7e1   :  { %v573_v15 = vpop.permute.xlu0 %572 }
 0x7e2   :  { %v2284_v16 = vmul.f32 %v1764_v60, %v573_v15 }
 0x7e4   :  { %v614_v17 = vpack.c.bf16 %v2284_v16, %v2284_v16 }
 0x7e5   :  { %v597_v18 = vpop.permute.xlu1 %596 }
 0x7e6   :  { %v2288_v19 = vmul.f32 %v1766_v63, %v597_v18  ;;  %616 = vrot.lane.b32.xlu0 %v614_v17, %s2045_s26 }
 0x7e8   :  { %v664_v20 = vpack.c.bf16 %v2288_v19, %v2288_v19 }
 0x7ea   :  { %666 = vrot.lane.b32.xlu1 %v664_v20, %s2045_s26 }
 0x858   :  { %v617_v21 = vpop.permute.xlu0 %616 }
 0x859   :  { %1628 = vmatmul.mubr.msk.bf16.vlgmr.msra.gmra.mxu0 %vm119_vm1, %v617_v21 }
 0x85a   :  { %1640 = vmatpush3.bf16.msra.mxu0 %v2152_v1  ;;  %1643 = vmatprep.mubr.msk.bf16.mxu0 %vm2052_vm0, %v2051_v0 }
 0x85b   :  { %1641 = vmatprep.subr.bf16.mxu0 %v2051_v0 }
 0x85c   :  { %v667_v22 = vpop.permute.xlu1 %666 }
 0x85d   :  { %1636 = vmatmul.mubr.msk.bf16.vlgmr.msra.gmra.mxu1 %vm119_vm1, %v667_v22 }
 0x85e   :  { %1642 = vmatpush3.bf16.msra.mxu0 %v2157_v3  ;;  %1648 = vmatpush3.bf16.msra.mxu1 %v2154_v2 }
 0x85f   :  { %1649 = vmatprep.subr.bf16.mxu1 %v2051_v0  ;;  %1651 = vmatprep.mubr.msk.bf16.mxu1 %vm2052_vm0, %v2051_v0 }
 0x860   :  { %1655 = vmatprep.subr.bf16.mxu0 %v2051_v0 }
 0x862   :  { %1650 = vmatpush3.bf16.msra.mxu1 %v2161_v4 }
 0x863   :  { %1663 = vmatprep.subr.bf16.mxu1 %v2051_v0 }
 0x919   :  { %v655_v24 = vpop.f32.mrf.mxu0 }
 0x91a   :  { %v661_v25 = vadd.f32 %v655_v24, %v613_v23 }
 0x91b   :  { %v1629_v26 = vpop.f32.mrf.mxu0 }
 0x91c   :  { %1771 = vtanh.f32 %v661_v25  ;;  %v1509_v39 = vmul.f32 -1.442695, %v661_v25 }
 0x91d   :  { %v658_v28 = vpop.f32.mrf.mxu0  ;;  %v705_v29 = vpop.f32.mrf.mxu1 }
 0x91e   :  { %v711_v30 = vadd.f32 %v705_v29, %v663_v27 }
 0x91f   :  { %v1630_v32 = vpop.f32.mrf.mxu0  ;;  %v1637_v33 = vpop.f32.mrf.mxu1 }
 0x920   :  { %1773 = vtanh.f32 %v711_v30  ;;  %v1510_v40 = vmul.f32 -1.442695, %v711_v30 }
 0x921   :  { %v708_v35 = vpop.f32.mrf.mxu1  ;;  %1775 = vpow2.f32 %v1509_v39 }
 0x922   :  { %1777 = vpow2.f32 %v1510_v40 }
 0x923   :  { %v1638_v36 = vpop.f32.mrf.mxu1 }
 0x929   :  { %v1772_v37 = vpop.eup %1771 }
 0x92a   :  { %721 = vrot.lane.b32.xlu0 %v1772_v37, %s2048_s1 }
 0x92d   :  { %v1774_v38 = vpop.eup %1773 }
 0x92e   :  { %745 = vrot.lane.b32.xlu1 %v1774_v38, %s2048_s1  ;;  %v1776_v41 = vpop.eup %1775 }
 0x92f   :  { %v715_v42 = vadd.f32 1.0, %v1776_v41  ;;  %v1778_v43 = vpop.eup %1777 }
 0x930   :  { %v739_v44 = vadd.f32 1.0, %v1778_v43 }
 0x931   :  { %1779 = vrcp.f32 %v715_v42 }
 0x932   :  { %1781 = vrcp.f32 %v739_v44 }
 0x93e   :  { %v1780_v45 = vpop.eup %1779 }
 0x93f   :  { %v1782_v49 = vpop.eup %1781  ;;  %v719_v53 = vmul.f32 %v1780_v45, %v2275_v9 }
 0x940   :  { %v743_v56 = vmul.f32 %v1782_v49, %v2279_v12 }
 0x99c   :  { %v722_v46 = vpop.permute.xlu0 %721 }
 0x99d   :  { %v724_v47 = vmul.f32 %v1780_v45, %v722_v46 }
 0x99f   :  { %726 = vrot.lane.b32.xlu0 %v724_v47, %s2045_s26 }
 0x9a0   :  { %v746_v50 = vpop.permute.xlu1 %745 }
 0x9a1   :  { %v748_v52 = vmul.f32 %v1782_v49, %v746_v50 }
 0x9a3   :  { %750 = vrot.lane.b32.xlu1 %v748_v52, %s2045_s26 }
 0xa11   :  { %v727_v54 = vpop.permute.xlu0 %726 }
 0xa12   :  { %v2313_v55 = vadd.f32 %v727_v54, %v719_v53 }
 0xa14   :  { %1783 = vtanh.f32 %v2313_v55 }
 0xa15   :  { %v751_v57 = vpop.permute.xlu1 %750 }
 0xa16   :  { %v2317_v58 = vadd.f32 %v751_v57, %v743_v56 }
 0xa18   :  { %1785 = vtanh.f32 %v2317_v58 }
 0xa21   :  { %v1784_v59 = vpop.eup %1783 }
 0xa22   :  { %732 = vrot.lane.b32.xlu0 %v1784_v59, %s2048_s1 }
 0xa25   :  { %v1786_v60 = vpop.eup %1785 }
 0xa26   :  { %756 = vrot.lane.b32.xlu1 %v1786_v60, %s2048_s1 }
 0xa94   :  { %v733_v61 = vpop.permute.xlu0 %732 }
 0xa95   :  { %v2322_v62 = vmul.f32 %v1780_v45, %v733_v61 }
 0xa97   :  { %v774_v63 = vpack.c.bf16 %v2322_v62, %v2322_v62 }
 0xa98   :  { %v757_v5 = vpop.permute.xlu1 %756 }
 0xa99   :  { %v2326_v6 = vmul.f32 %v1782_v49, %v757_v5  ;;  %776 = vrot.lane.b32.xlu0 %v774_v63, %s2045_s26  ;;  %v981_v63 = vld [vmem:[#allocation5 + $0x4] sm:$0x3] }
 0xa9b   :  { %v824_v7 = vpack.c.bf16 %v2326_v6, %v2326_v6 }
 0xa9d   :  { %826 = vrot.lane.b32.xlu1 %v824_v7, %s2045_s26 }
 0xb0b   :  { %v777_v8 = vpop.permute.xlu0 %776 }
 0xb0c   :  { %1644 = vmatmul.mubr.msk.bf16.vlgmr.msra.gmra.mxu0 %vm119_vm1, %v777_v8 }
 0xb0d   :  { %1656 = vmatpush3.bf16.msra.mxu0 %v2152_v1  ;;  %1659 = vmatprep.mubr.msk.bf16.mxu0 %vm2052_vm0, %v2051_v0 }
 0xb0e   :  { %1657 = vmatprep.subr.bf16.mxu0 %v2051_v0 }
 0xb0f   :  { %v827_v9 = vpop.permute.xlu1 %826 }
 0xb10   :  { %1652 = vmatmul.mubr.msk.bf16.vlgmr.msra.gmra.mxu1 %vm119_vm1, %v827_v9 }
 0xb11   :  { %1658 = vmatpush3.bf16.msra.mxu0 %v2157_v3  ;;  %1664 = vmatpush3.bf16.msra.mxu1 %v2154_v2 }
 0xb12   :  { %1665 = vmatprep.subr.bf16.mxu1 %v2051_v0  ;;  %1667 = vmatprep.mubr.msk.bf16.mxu1 %vm2052_vm0, %v2051_v0 }
 0xb13   :  { %1671 = vmatprep.subr.bf16.mxu0 %v2051_v0 }
 0xb15   :  { %1666 = vmatpush3.bf16.msra.mxu1 %v2161_v4 }
 0xb16   :  { %1679 = vmatprep.subr.bf16.mxu1 %v2051_v0 }
 0xbcc   :  { %v815_v11 = vpop.f32.mrf.mxu0 }
 0xbcd   :  { %v821_v12 = vadd.f32 %v815_v11, %v773_v10 }
 0xbce   :  { %v1645_v13 = vpop.f32.mrf.mxu0 }
 0xbcf   :  { %1787 = vtanh.f32 %v821_v12  ;;  %v1513_v26 = vmul.f32 -1.442695, %v821_v12 }
 0xbd0   :  { %v818_v15 = vpop.f32.mrf.mxu0  ;;  %v865_v17 = vpop.f32.mrf.mxu1 }
 0xbd1   :  { %v871_v18 = vadd.f32 %v865_v17, %v823_v14 }
 0xbd2   :  { %v1646_v20 = vpop.f32.mrf.mxu0  ;;  %v1653_v21 = vpop.f32.mrf.mxu1 }
 0xbd3   :  { %1789 = vtanh.f32 %v871_v18  ;;  %v1514_v27 = vmul.f32 -1.442695, %v871_v18 }
 0xbd4   :  { %v868_v22 = vpop.f32.mrf.mxu1  ;;  %1791 = vpow2.f32 %v1513_v26 }
 0xbd5   :  { %1793 = vpow2.f32 %v1514_v27 }
 0xbd6   :  { %v1654_v23 = vpop.f32.mrf.mxu1 }
 0xbdc   :  { %v1788_v24 = vpop.eup %1787 }
 0xbdd   :  { %881 = vrot.lane.b32.xlu0 %v1788_v24, %s2048_s1 }
 0xbe0   :  { %v1790_v25 = vpop.eup %1789 }
 0xbe1   :  { %905 = vrot.lane.b32.xlu1 %v1790_v25, %s2048_s1  ;;  %v1792_v28 = vpop.eup %1791 }
 0xbe2   :  { %v875_v29 = vadd.f32 1.0, %v1792_v28  ;;  %v1794_v30 = vpop.eup %1793 }
 0xbe3   :  { %v899_v32 = vadd.f32 1.0, %v1794_v30 }
 0xbe4   :  { %1795 = vrcp.f32 %v875_v29 }
 0xbe5   :  { %1797 = vrcp.f32 %v899_v32 }
 0xbf1   :  { %v1796_v33 = vpop.eup %1795 }
 0xbf2   :  { %v1798_v37 = vpop.eup %1797  ;;  %v879_v40 = vmul.f32 %v1796_v33, %v2313_v55 }
 0xbf3   :  { %v903_v43 = vmul.f32 %v1798_v37, %v2317_v58  ;;  %v931_v58 = vld [vmem:[#allocation2 + $0xa] sm:$0x3] }
 0xc4f   :  { %v882_v35 = vpop.permute.xlu0 %881 }
 0xc50   :  { %v884_v36 = vmul.f32 %v1796_v33, %v882_v35 }
 0xc52   :  { %886 = vrot.lane.b32.xlu0 %v884_v36, %s2045_s26 }
 0xc53   :  { %v906_v38 = vpop.permute.xlu1 %905 }
 0xc54   :  { %v908_v39 = vmul.f32 %v1798_v37, %v906_v38 }
 0xc56   :  { %910 = vrot.lane.b32.xlu1 %v908_v39, %s2045_s26 }
 0xcc4   :  { %v887_v41 = vpop.permute.xlu0 %886 }
 0xcc5   :  { %v2351_v42 = vadd.f32 %v887_v41, %v879_v40 }
 0xcc7   :  { %1799 = vtanh.f32 %v2351_v42 }
 0xcc8   :  { %v911_v44 = vpop.permute.xlu1 %910 }
 0xcc9   :  { %v2355_v45 = vadd.f32 %v911_v44, %v903_v43 }
 0xccb   :  { %1801 = vtanh.f32 %v2355_v45 }
 0xcd4   :  { %v1800_v46 = vpop.eup %1799 }
 0xcd5   :  { %892 = vrot.lane.b32.xlu0 %v1800_v46, %s2048_s1 }
 0xcd8   :  { %v1802_v47 = vpop.eup %1801 }
 0xcd9   :  { %916 = vrot.lane.b32.xlu1 %v1802_v47, %s2048_s1 }
 0xd47   :  { %v893_v49 = vpop.permute.xlu0 %892 }
 0xd48   :  { %v2360_v50 = vmul.f32 %v1796_v33, %v893_v49 }
 0xd4a   :  { %v932_v52 = vpack.c.bf16 %v2360_v50, %v2360_v50 }
 0xd4b   :  { %v917_v53 = vpop.permute.xlu1 %916 }
 0xd4c   :  { %v2364_v54 = vmul.f32 %v1798_v37, %v917_v53  ;;  %934 = vrot.lane.b32.xlu0 %v932_v52, %s2045_s26  ;;  %v1139_v53 = vld [vmem:[#allocation5 + $0x2] sm:$0x3] }
 0xd4e   :  { %v982_v55 = vpack.c.bf16 %v2364_v54, %v2364_v54 }
 0xd50   :  { %984 = vrot.lane.b32.xlu1 %v982_v55, %s2045_s26 }
 0xdbe   :  { %v935_v56 = vpop.permute.xlu0 %934 }
 0xdbf   :  { %1660 = vmatmul.mubr.msk.bf16.vlgmr.msra.gmra.mxu0 %vm119_vm1, %v935_v56 }
 0xdc0   :  { %1672 = vmatpush3.bf16.msra.mxu0 %v2152_v1  ;;  %1675 = vmatprep.mubr.msk.bf16.mxu0 %vm2052_vm0, %v2051_v0 }
 0xdc1   :  { %1673 = vmatprep.subr.bf16.mxu0 %v2051_v0 }
 0xdc2   :  { %v985_v57 = vpop.permute.xlu1 %984 }
 0xdc3   :  { %1668 = vmatmul.mubr.msk.bf16.vlgmr.msra.gmra.mxu1 %vm119_vm1, %v985_v57 }
 0xdc4   :  { %1674 = vmatpush3.bf16.msra.mxu0 %v2157_v3  ;;  %1680 = vmatpush3.bf16.msra.mxu1 %v2154_v2 }
 0xdc5   :  { %1681 = vmatprep.subr.bf16.mxu1 %v2051_v0  ;;  %1683 = vmatprep.mubr.msk.bf16.mxu1 %vm2052_vm0, %v2051_v0 }
 0xdc6   :  { %1687 = vmatprep.subr.bf16.mxu0 %v2051_v0 }
 0xdc8   :  { %1682 = vmatpush3.bf16.msra.mxu1 %v2161_v4 }
 0xdc9   :  { %1695 = vmatprep.subr.bf16.mxu1 %v2051_v0 }
 0xe7f   :  { %v973_v59 = vpop.f32.mrf.mxu0 }
 0xe80   :  { %v979_v60 = vadd.f32 %v973_v59, %v931_v58 }
 0xe81   :  { %v1661_v61 = vpop.f32.mrf.mxu0 }
 0xe82   :  { %1803 = vtanh.f32 %v979_v60  ;;  %v1517_v15 = vmul.f32 -1.442695, %v979_v60 }
 0xe83   :  { %v976_v5 = vpop.f32.mrf.mxu0  ;;  %v1023_v7 = vpop.f32.mrf.mxu1 }
 0xe84   :  { %v1029_v8 = vadd.f32 %v1023_v7, %v981_v63 }
 0xe85   :  { %v1662_v9 = vpop.f32.mrf.mxu0  ;;  %v1669_v10 = vpop.f32.mrf.mxu1 }
 0xe86   :  { %1805 = vtanh.f32 %v1029_v8  ;;  %v1518_v17 = vmul.f32 -1.442695, %v1029_v8 }
 0xe87   :  { %v1026_v11 = vpop.f32.mrf.mxu1  ;;  %1807 = vpow2.f32 %v1517_v15 }
 0xe88   :  { %1809 = vpow2.f32 %v1518_v17 }
 0xe89   :  { %v1670_v12 = vpop.f32.mrf.mxu1 }
 0xe8f   :  { %v1804_v13 = vpop.eup %1803 }
 0xe90   :  { %1039 = vrot.lane.b32.xlu0 %v1804_v13, %s2048_s1 }
 0xe93   :  { %v1806_v14 = vpop.eup %1805 }
 0xe94   :  { %1063 = vrot.lane.b32.xlu1 %v1806_v14, %s2048_s1  ;;  %v1808_v18 = vpop.eup %1807 }
 0xe95   :  { %v1033_v20 = vadd.f32 1.0, %v1808_v18  ;;  %v1810_v21 = vpop.eup %1809 }
 0xe96   :  { %v1057_v22 = vadd.f32 1.0, %v1810_v21 }
 0xe97   :  { %1811 = vrcp.f32 %v1033_v20 }
 0xe98   :  { %1813 = vrcp.f32 %v1057_v22 }
 0xea4   :  { %v1812_v23 = vpop.eup %1811 }
 0xea5   :  { %v1814_v26 = vpop.eup %1813  ;;  %v1037_v29 = vmul.f32 %v1812_v23, %v2351_v42 }
 0xea6   :  { %v1061_v33 = vmul.f32 %v1814_v26, %v2355_v45 }
 0xf02   :  { %v1040_v24 = vpop.permute.xlu0 %1039 }
 0xf03   :  { %v1042_v25 = vmul.f32 %v1812_v23, %v1040_v24 }
 0xf05   :  { %1044 = vrot.lane.b32.xlu0 %v1042_v25, %s2045_s26 }
 0xf06   :  { %v1064_v27 = vpop.permute.xlu1 %1063 }
 0xf07   :  { %v1066_v28 = vmul.f32 %v1814_v26, %v1064_v27 }
 0xf09   :  { %1068 = vrot.lane.b32.xlu1 %v1066_v28, %s2045_s26 }
 0xf77   :  { %v1045_v30 = vpop.permute.xlu0 %1044 }
 0xf78   :  { %v2389_v32 = vadd.f32 %v1045_v30, %v1037_v29 }
 0xf7a   :  { %1815 = vtanh.f32 %v2389_v32 }
 0xf7b   :  { %v1069_v35 = vpop.permute.xlu1 %1068 }
 0xf7c   :  { %v2393_v36 = vadd.f32 %v1069_v35, %v1061_v33  ;;  %v1247_v35 = vld [vmem:[#allocation2 + $0xe] sm:$0x3] }
 0xf7e   :  { %1817 = vtanh.f32 %v2393_v36 }
 0xf87   :  { %v1816_v37 = vpop.eup %1815 }
 0xf88   :  { %1050 = vrot.lane.b32.xlu0 %v1816_v37, %s2048_s1 }
 0xf8b   :  { %v1818_v38 = vpop.eup %1817 }
 0xf8c   :  { %1074 = vrot.lane.b32.xlu1 %v1818_v38, %s2048_s1 }
 0xffa   :  { %v1051_v39 = vpop.permute.xlu0 %1050 }
 0xffb   :  { %v2398_v40 = vmul.f32 %v1812_v23, %v1051_v39  ;;  %v1296_v39 = vld [vmem:[#allocation5] sm:$0x3] }
 0xffd   :  { %v1090_v41 = vpack.c.bf16 %v2398_v40, %v2398_v40 }
 0xffe   :  { %v1075_v42 = vpop.permute.xlu1 %1074 }
 0xfff   :  { %v2402_v43 = vmul.f32 %v1814_v26, %v1075_v42  ;;  %1092 = vrot.lane.b32.xlu0 %v1090_v41, %s2045_s26 }
0x1001   :  { %v1140_v44 = vpack.c.bf16 %v2402_v43, %v2402_v43 }
0x1003   :  { %1142 = vrot.lane.b32.xlu1 %v1140_v44, %s2045_s26 }
0x1071   :  { %v1093_v45 = vpop.permute.xlu0 %1092 }
0x1072   :  { %1676 = vmatmul.mubr.msk.bf16.vlgmr.msra.gmra.mxu0 %vm119_vm1, %v1093_v45 }
0x1073   :  { %1688 = vmatpush3.bf16.msra.mxu0 %v2152_v1  ;;  %1691 = vmatprep.mubr.msk.bf16.mxu0 %vm2052_vm0, %v2051_v0  ;;  %v1089_v1 = vld [vmem:[#allocation2 + $0xc] sm:$0x3] }
0x1074   :  { %1689 = vmatprep.subr.bf16.mxu0 %v2051_v0 }
0x1075   :  { %v1143_v46 = vpop.permute.xlu1 %1142 }
0x1076   :  { %1684 = vmatmul.mubr.msk.bf16.vlgmr.msra.gmra.mxu1 %vm119_vm1, %v1143_v46 }
0x1077   :  { %1690 = vmatpush3.bf16.msra.mxu0 %v2157_v3  ;;  %1696 = vmatpush3.bf16.msra.mxu1 %v2154_v2 }
0x1078   :  { %1697 = vmatprep.subr.bf16.mxu1 %v2051_v0  ;;  %1699 = vmatprep.mubr.msk.bf16.mxu1 %vm2052_vm0, %v2051_v0 }
0x107b   :  { %1698 = vmatpush3.bf16.msra.mxu1 %v2161_v4 }
0x1132   :  { %v1131_v47 = vpop.f32.mrf.mxu0 }
0x1133   :  { %v1137_v49 = vadd.f32 %v1131_v47, %v1089_v1 }
0x1134   :  { %v1677_v52 = vpop.f32.mrf.mxu0 }
0x1135   :  { %1819 = vtanh.f32 %v1137_v49  ;;  %v1521_v4 = vmul.f32 -1.442695, %v1137_v49 }
0x1136   :  { %v1134_v55 = vpop.f32.mrf.mxu0  ;;  %v1181_v56 = vpop.f32.mrf.mxu1 }
0x1137   :  { %v1187_v57 = vadd.f32 %v1181_v56, %v1139_v53 }
0x1138   :  { %v1678_v58 = vpop.f32.mrf.mxu0  ;;  %v1685_v3 = vpop.f32.mrf.mxu1 }
0x1139   :  { %1821 = vtanh.f32 %v1187_v57  ;;  %v1522_v61 = vmul.f32 -1.442695, %v1187_v57 }
0x113a   :  { %v1184_v2 = vpop.f32.mrf.mxu1  ;;  %1823 = vpow2.f32 %v1521_v4 }
0x113b   :  { %1825 = vpow2.f32 %v1522_v61 }
0x113c   :  { %v1686_v59 = vpop.f32.mrf.mxu1 }
0x1142   :  { %v1820_v60 = vpop.eup %1819 }
0x1143   :  { %1197 = vrot.lane.b32.xlu0 %v1820_v60, %s2048_s1 }
0x1146   :  { %v1822_v0 = vpop.eup %1821 }
0x1147   :  { %1221 = vrot.lane.b32.xlu1 %v1822_v0, %s2048_s1  ;;  %v1824_v63 = vpop.eup %1823 }
0x1148   :  { %v1191_v5 = vadd.f32 1.0, %v1824_v63  ;;  %v1826_v7 = vpop.eup %1825 }
0x1149   :  { %v1215_v8 = vadd.f32 1.0, %v1826_v7 }
0x114a   :  { %1827 = vrcp.f32 %v1191_v5 }
0x114b   :  { %1829 = vrcp.f32 %v1215_v8 }
0x1157   :  { %v1828_v9 = vpop.eup %1827 }
0x1158   :  { %v1830_v12 = vpop.eup %1829  ;;  %v1195_v15 = vmul.f32 %v1828_v9, %v2389_v32 }
0x1159   :  { %v1219_v20 = vmul.f32 %v1830_v12, %v2393_v36 }
0x11b5   :  { %v1198_v10 = vpop.permute.xlu0 %1197 }
0x11b6   :  { %v1200_v11 = vmul.f32 %v1828_v9, %v1198_v10 }
0x11b8   :  { %1202 = vrot.lane.b32.xlu0 %v1200_v11, %s2045_s26 }
0x11b9   :  { %v1222_v13 = vpop.permute.xlu1 %1221 }
0x11ba   :  { %v1224_v14 = vmul.f32 %v1830_v12, %v1222_v13 }
0x11bc   :  { %1226 = vrot.lane.b32.xlu1 %v1224_v14, %s2045_s26 }
0x122a   :  { %v1203_v17 = vpop.permute.xlu0 %1202 }
0x122b   :  { %v1205_v18 = vadd.f32 %v1203_v17, %v1195_v15 }
0x122d   :  { %1831 = vtanh.f32 %v1205_v18 }
0x122e   :  { %v1227_v21 = vpop.permute.xlu1 %1226 }
0x122f   :  { %v1229_v22 = vadd.f32 %v1227_v21, %v1219_v20 }
0x1231   :  { %1833 = vtanh.f32 %v1229_v22 }
0x123a   :  { %v1832_v23 = vpop.eup %1831 }
0x123b   :  { %1208 = vrot.lane.b32.xlu0 %v1832_v23, %s2048_s1 }
0x123e   :  { %v1834_v24 = vpop.eup %1833 }
0x123f   :  { %1232 = vrot.lane.b32.xlu1 %v1834_v24, %s2048_s1 }
0x12ad   :  { %v1209_v25 = vpop.permute.xlu0 %1208 }
0x12ae   :  { %v2428_v26 = vmul.f32 %v1828_v9, %v1209_v25 }
0x12b0   :  { %v1248_v27 = vpack.c.bf16 %v2428_v26, %v2428_v26 }
0x12b1   :  { %v1233_v28 = vpop.permute.xlu1 %1232 }
0x12b2   :  { %v2432_v29 = vmul.f32 %v1830_v12, %v1233_v28  ;;  %1250 = vrot.lane.b32.xlu0 %v1248_v27, %s2045_s26 }
0x12b4   :  { %v1297_v30 = vpack.c.bf16 %v2432_v29, %v2432_v29 }
0x12b6   :  { %1299 = vrot.lane.b32.xlu1 %v1297_v30, %s2045_s26 }
0x1324   :  { %v1251_v32 = vpop.permute.xlu0 %1250 }
0x1325   :  { %1692 = vmatmul.mubr.msk.bf16.vlgmr.msra.gmra.mxu0 %vm119_vm1, %v1251_v32 }
0x1328   :  { %v1300_v33 = vpop.permute.xlu1 %1299 }
0x1329   :  { %1700 = vmatmul.mubr.msk.bf16.vlgmr.msra.gmra.mxu1 %vm119_vm1, %v1300_v33 }
0x13e5   :  { %v1289_v36 = vpop.f32.mrf.mxu0 }
0x13e6   :  { %v1295_v37 = vadd.f32 %v1289_v36, %v1247_v35 }
0x13e7   :  { %v1693_v38 = vpop.f32.mrf.mxu0 }
0x13e8   :  { %1835 = vtanh.f32 %v1295_v37  ;;  %v1525_v53 = vmul.f32 -1.442695, %v1295_v37 }
0x13e9   :  { %v1292_v41 = vpop.f32.mrf.mxu0  ;;  %v1338_v42 = vpop.f32.mrf.mxu1 }
0x13ea   :  { %v1344_v44 = vadd.f32 %v1338_v42, %v1296_v39 }
0x13eb   :  { %v1694_v45 = vpop.f32.mrf.mxu0  ;;  %v1701_v46 = vpop.f32.mrf.mxu1 }
0x13ec   :  { %1837 = vtanh.f32 %v1344_v44  ;;  %v1526_v55 = vmul.f32 -1.442695, %v1344_v44 }
0x13ed   :  { %v1341_v1 = vpop.f32.mrf.mxu1  ;;  %1839 = vpow2.f32 %v1525_v53 }
0x13ee   :  { %1841 = vpow2.f32 %v1526_v55 }
0x13ef   :  { %v1702_v47 = vpop.f32.mrf.mxu1 }
0x13f5   :  { %v1836_v49 = vpop.eup %1835 }
0x13f6   :  { %1354 = vrot.lane.b32.xlu0 %v1836_v49, %s2048_s1 }
0x13f9   :  { %v1838_v52 = vpop.eup %1837 }
0x13fa   :  { %1378 = vrot.lane.b32.xlu1 %v1838_v52, %s2048_s1  ;;  %v1840_v56 = vpop.eup %1839 }
0x13fb   :  { %v1348_v57 = vadd.f32 1.0, %v1840_v56  ;;  %v1842_v58 = vpop.eup %1841 }
0x13fc   :  { %v1372_v3 = vadd.f32 1.0, %v1842_v58 }
0x13fd   :  { %1843 = vrcp.f32 %v1348_v57 }
0x13fe   :  { %1845 = vrcp.f32 %v1372_v3 }
0x140a   :  { %v1844_v2 = vpop.eup %1843 }
0x140b   :  { %v1846_v0 = vpop.eup %1845  ;;  %v1352_v63 = vmul.f32 %v1844_v2, %v1205_v18 }
0x140c   :  { %v1376_v8 = vmul.f32 %v1846_v0, %v1229_v22 }
0x1468   :  { %v1355_v59 = vpop.permute.xlu0 %1354 }
0x1469   :  { %v1357_v60 = vmul.f32 %v1844_v2, %v1355_v59 }
0x146b   :  { %1359 = vrot.lane.b32.xlu0 %v1357_v60, %s2045_s26 }
0x146c   :  { %v1379_v4 = vpop.permute.xlu1 %1378 }
0x146d   :  { %v1381_v61 = vmul.f32 %v1846_v0, %v1379_v4 }
0x146f   :  { %1383 = vrot.lane.b32.xlu1 %v1381_v61, %s2045_s26 }
0x14dd   :  { %v1360_v5 = vpop.permute.xlu0 %1359 }
0x14de   :  { %v1362_v7 = vadd.f32 %v1360_v5, %v1352_v63 }
0x14e0   :  { %1847 = vtanh.f32 %v1362_v7 }
0x14e1   :  { %v1384_v9 = vpop.permute.xlu1 %1383 }
0x14e2   :  { %v1386_v10 = vadd.f32 %v1384_v9, %v1376_v8 }
0x14e4   :  { %1849 = vtanh.f32 %v1386_v10 }
0x14ed   :  { %v1848_v11 = vpop.eup %1847 }
0x14ee   :  { %1365 = vrot.lane.b32.xlu0 %v1848_v11, %s2048_s1 }
0x14f1   :  { %v1850_v12 = vpop.eup %1849 }
0x14f2   :  { %1389 = vrot.lane.b32.xlu1 %v1850_v12, %s2048_s1  ;;  %280 = vrot.lane.b32.xlu0 %v2208_v48, %s2045_s26 }
0x14f6   :  { %286 = vrot.lane.b32.xlu1 %v2212_v51, %s2048_s1  ;;  %441 = vrot.lane.b32.xlu0 %v2246_v31, %s2045_s26 }
0x14fa   :  { %447 = vrot.lane.b32.xlu1 %v2250_v34, %s2048_s1  ;;  %601 = vrot.lane.b32.xlu0 %v2284_v16, %s2045_s26 }
0x14fe   :  { %607 = vrot.lane.b32.xlu1 %v2288_v19, %s2048_s1  ;;  %761 = vrot.lane.b32.xlu0 %v2322_v62, %s2045_s26 }
0x1502   :  { %767 = vrot.lane.b32.xlu1 %v2326_v6, %s2048_s1  ;;  %921 = vrot.lane.b32.xlu0 %v2360_v50, %s2045_s26 }
0x1506   :  { %926 = vrot.lane.b32.xlu1 %v2364_v54, %s2048_s1  ;;  %1079 = vrot.lane.b32.xlu0 %v2398_v40, %s2045_s26 }
0x150a   :  { %1084 = vrot.lane.b32.xlu1 %v2402_v43, %s2048_s1  ;;  %1237 = vrot.lane.b32.xlu0 %v2428_v26, %s2045_s26 }
0x150e   :  { %1242 = vrot.lane.b32.xlu1 %v2432_v29, %s2048_s1 }
0x1560   :  { %v1366_v48 = vpop.permute.xlu0 %1365 }
0x1561   :  { %v1368_v51 = vmul.f32 %v1844_v2, %v1366_v48 }
0x1563   :  { %1394 = vrot.lane.b32.xlu0 %v1368_v51, %s2045_s26 }
0x1564   :  { %v1390_v31 = vpop.permute.xlu1 %1389  ;;  %v281_v34 = vpop.permute.xlu0 %280 }
0x1565   :  { %v1392_v16 = vmul.f32 %v1846_v0, %v1390_v31  ;;  %284 = vst.msk [vmem:[#allocation10] sm:$0x3] %vm283_vm2, %v281_v34 }
0x1567   :  { %1409 = vrot.lane.b32.xlu1 %v1392_v16, %s2045_s26  ;;  %1399 = vrot.lane.b32.xlu0 %v1392_v16, %s2048_s1  ;;  %s2057_s1 = smov [#allocation13]  }
0x1568   :  { %v287_v19 = vpop.permute.xlu1 %286  ;;  %v442_v62 = vpop.permute.xlu0 %441  ;;  %s1446_s18 = sshll.u32 %s2057_s1, 4  ;;  %s2498_s18 = int_to_ptr.vmem [resolvable:$true] %s1446_s18 }
0x1569   :  { %291 = vst.msk [vmem:[#allocation10 + $0xe] sm:$0x3] %vm290_vm3, %v287_v19 }
0x156a   :  { %445 = vst.msk [vmem:[#allocation10 + $0x2] sm:$0x3] %vm283_vm2, %v442_v62 }
0x156b   :  { %1405 = vrot.lane.b32.xlu1 %v1362_v7, %s2053_s2  ;;  %1414 = vrot.lane.b32.xlu0 %v1386_v10, %s2053_s2 }
0x156c   :  { %v448_v6 = vpop.permute.xlu1 %447  ;;  %v602_v50 = vpop.permute.xlu0 %601 }
0x156d   :  { %451 = vst.msk [vmem:[#allocation10 + $0xc] sm:$0x3] %vm290_vm3, %v448_v6 }
0x156e   :  { %605 = vst.msk [vmem:[#allocation10 + $0x4] sm:$0x3] %vm283_vm2, %v602_v50 }
0x1570   :  { %v608_v54 = vpop.permute.xlu1 %607  ;;  %v762_v40 = vpop.permute.xlu0 %761 }
0x1571   :  { %611 = vst.msk [vmem:[#allocation10 + $0xa] sm:$0x3] %vm290_vm3, %v608_v54 }
0x1572   :  { %765 = vst.msk [vmem:[#allocation10 + $0x6] sm:$0x3] %vm283_vm2, %v762_v40 }
0x1574   :  { %v768_v43 = vpop.permute.xlu1 %767  ;;  %v922_v13 = vpop.permute.xlu0 %921 }
0x1575   :  { %771 = vst.msk [vmem:[#allocation10 + $0x8] sm:$0x3] %vm290_vm3, %v768_v43 }
0x1576   :  { %924 = vst.msk [vmem:[#allocation10 + $0x8] sm:$0x3] %vm283_vm2, %v922_v13 }
0x1578   :  { %v927_v14 = vpop.permute.xlu1 %926  ;;  %v1080_v15 = vpop.permute.xlu0 %1079 }
0x1579   :  { %929 = vst.msk [vmem:[#allocation10 + $0x6] sm:$0x3] %vm290_vm3, %v927_v14 }
0x157a   :  { %1082 = vst.msk [vmem:[#allocation10 + $0xa] sm:$0x3] %vm283_vm2, %v1080_v15 }
0x157c   :  { %v1085_v17 = vpop.permute.xlu1 %1084  ;;  %v1238_v18 = vpop.permute.xlu0 %1237 }
0x157d   :  { %1087 = vst.msk [vmem:[#allocation10 + $0x4] sm:$0x3] %vm290_vm3, %v1085_v17 }
0x157e   :  { %1240 = vst.msk [vmem:[#allocation10 + $0xc] sm:$0x3] %vm283_vm2, %v1238_v18 }
0x1580   :  { %v1243_v20 = vpop.permute.xlu1 %1242 }
0x1581   :  { %1245 = vst.msk [vmem:[#allocation10 + $0x2] sm:$0x3] %vm290_vm3, %v1243_v20 }
0x15d5   :  { %v1395_v21 = vpop.permute.xlu0 %1394 }
0x15d6   :  { %1397 = vst.msk [vmem:[#allocation10 + $0xe] sm:$0x3] %vm283_vm2, %v1395_v21  ;;  %1403 = vst.msk [vmem:[#allocation11] sm:$0x3] %vm283_vm2, %v1395_v21 }
0x15d7   :  { %1942 = shalt.err (!%p1939_p10)
}
0x15d8   :  { %1439 = dma.vmem_to_hbm [thread:$0]  %s1437_s4, 32, %s2531_s9, [#allocation12]  }
0x15d9   :  { %v1410_v22 = vpop.permute.xlu1 %1409  ;;  %v1400_v23 = vpop.permute.xlu0 %1399  ;;  %s2058_s0 = smov [#allocation16]   ;;  %s1951_s23 = scalar_lea.vmem %s1457_s15, 32 }
0x15da   :  { %1412 = vst.msk [vmem:[#allocation14] sm:$0x3] %vm283_vm2, %v1410_v22  ;;  %s1466_s22 = sshll.u32 %s2058_s0, 4  ;;  %p1952_p11 = scmp.ne.s32.totalorder %s1457_s15, %s1951_s23  ;;  %s1467_s22 = int_to_ptr.vmem [resolvable:$true] %s1466_s22 }
0x15db   :  { %1402 = vst.msk [vmem:[#allocation10] sm:$0x3] %vm290_vm3, %v1400_v23  ;;  %p1956_p12 = scmp.lt.s32.totalorder %s1457_s15, %s1457_s15  ;;  %p1957_p13 = scmp.lt.s32.totalorder %s1951_s23, %s1951_s23 }
0x15dd   :  { %p1958_p0 = por %p1957_p13, %p1956_p12 }
0x15df   :  { %p1959_p1 = pnand %p1958_p0, %p1952_p11 }
0x15e1   :  { %1962 = shalt.err (!%p1959_p1)
}
0x15e2   :  { %1459 = dma.vmem_to_hbm [thread:$0]  %s1457_s15, 32, %s2533_s11, [#allocation15]  }
0x15e3   :  { %s1971_s6 = scalar_lea.vmem %s1424_s17, 256  ;;  %p1976_p3 = scmp.lt.s32.totalorder %s1424_s17, %s1424_s17 }
0x15e4   :  { %p1972_p2 = scmp.ne.s32.totalorder %s1424_s17, %s1971_s6  ;;  %p1977_p4 = scmp.lt.s32.totalorder %s1971_s6, %s1971_s6 }
0x15e6   :  { %p1978_p5 = por %p1977_p4, %p1976_p3 }
0x15e8   :  { %p1979_p6 = pnand %p1978_p5, %p1972_p2 }
0x15ea   :  { %1982 = shalt.err (!%p1979_p6)
}
0x15eb   :  { %1429 = dma.vmem_to_hbm [thread:$0]  %s1424_s17, 256, %s2530_s8, [#allocation4], %s2045_s26, %s2045_s26, %s2046_s27   ;;  %v1406_v24 = vpop.permute.xlu1 %1405  ;;  %v1415_v25 = vpop.permute.xlu0 %1414 }
0x15ec   :  { %1408 = vst.msk [vmem:[#allocation13] sm:$0x3] %vm283_vm2, %v1406_v24  ;;  %1417 = vst.msk [vmem:[#allocation16] sm:$0x3] %vm283_vm2, %v1415_v25  ;;  %s1991_s11 = scalar_lea.vmem %s2498_s18, 32  ;;  %p1996_p8 = scmp.lt.s32.totalorder %s2498_s18, %s2498_s18 }
0x15ed   :  { %p1992_p7 = scmp.ne.s32.totalorder %s2498_s18, %s1991_s11  ;;  %p1997_p9 = scmp.lt.s32.totalorder %s1991_s11, %s1991_s11 }
0x15ef   :  { %p1998_p10 = por %p1997_p9, %p1996_p8 }
0x15f1   :  { %p1999_p11 = pnand %p1998_p10, %p1992_p7 }
0x15f3   :  { %2002 = shalt.err (!%p1999_p11)
}
0x15f4   :  { %1449 = dma.vmem_to_hbm [thread:$0]  %s2498_s18, 32, %s2532_s10, [#allocation12]  }
0x15f5   :  { %s2011_s8 = scalar_lea.vmem %s1467_s22, 32  ;;  %p2016_p13 = scmp.lt.s32.totalorder %s1467_s22, %s1467_s22 }
0x15f6   :  { %p2012_p12 = scmp.ne.s32.totalorder %s1467_s22, %s2011_s8  ;;  %p2017_p0 = scmp.lt.s32.totalorder %s2011_s8, %s2011_s8 }
0x15f8   :  { %p2018_p1 = por %p2017_p0, %p2016_p13 }
0x15fa   :  { %p2019_p2 = pnand %p2018_p1, %p2012_p12 }
0x15fc   :  { %2022 = shalt.err (!%p2019_p2)
}
0x15fd   :  { %1469 = dma.vmem_to_hbm [thread:$0]  %s1467_s22, 32, %s2534_s12, [#allocation15]  }
0x15fe   :  { %2037 = dma.done.wait [#allocation4], 256  }
0x15ff   :  { %2038 = vsyncadd [#allocation4], 4294967040 }
0x1600   :  { %2039 = dma.done.wait [#allocation12], 64  }
0x1601   :  { %2040 = vsyncadd [#allocation12], 4294967232 }
0x1602   :  { %2041 = dma.done.wait [#allocation15], 64  }
0x1603   :  { %2042 = vsyncadd [#allocation15], 4294967232 }
0x1604   :  { %1485 = vsyncpa [#allocation3], 1 }
0x1605   :  { %1486 = vsyncpa [#allocation6], 1 }
0x1606   :  { %1487 = vsyncpa [#allocation9], 1 }
0x1607   :  { %1488 = vsyncpa [#allocation4], 1 }
0x1608   :  { %1489 = vsyncpa [#allocation12], 1 }
0x1609   :  { %1490 = vsyncpa [#allocation15], 1 }

</bundles_post_ra>
